<compile_context>
chip_gen: v7x
topology: tpu7x:2x2x1
jax: 0.10.0
libtpu: 0.0.40
codegen_flags: <defaults>
</compile_context>

<pallas_src>
import functools

import jax
import jax.numpy as jnp
from jax.experimental import pallas as pl
from jax.experimental.pallas import tpu as pltpu


def _embed_gather_kernel(tok_block, ids_ref, table_ref, out_ref, buf_ref, sem_ref):
    """Refs:
      ids_ref   : SMEM (n_tokens_padded,) int32   -- scalar-prefetched token ids
      table_ref : HBM  (V, D)                     -- embedding table (pl.ANY)
      out_ref   : VMEM (tok_block, D)             -- output tile for this step
      buf_ref   : VMEM (2, tok_block, D)          -- double-buffered row scratch
      sem_ref   : DMA sems (2, tok_block)
    """
    blk = pl.program_id(0)
    nblk = pl.num_programs(0)

    def issue_block(block_idx, slot):
        # Gather `tok_block` table rows into VMEM buffer `slot`. All DMAs are
        # issued back-to-back so they are concurrently in flight (latency
        # hiding for the many small per-row copies).
        for j in range(tok_block):
            row = ids_ref[block_idx * tok_block + j]
            pltpu.make_async_copy(
                table_ref.at[pl.ds(row, 1)],        # (1, D) HBM row
                buf_ref.at[slot, pl.ds(j, 1)],      # (1, D) VMEM slot
                sem_ref.at[slot, j],
            ).start()

    slot = blk % 2

    # Prime the pipeline on the first grid step.
    @pl.when(blk == 0)
    def _():
        issue_block(0, 0)

    # Prefetch the NEXT block into the other buffer *before* waiting on the
    # current block, so those DMAs overlap the wait + store + output writeback.
    # (Buffer 1-slot was fully consumed and its semaphores drained on the
    # previous grid step, so reuse here is safe.)
    @pl.when(blk + 1 < nblk)
    def _():
        issue_block(blk + 1, 1 - slot)

    # Wait for the current block's rows (issued on the previous step, or in
    # the priming branch above when blk == 0).
    for j in range(tok_block):
        pltpu.make_async_copy(
            table_ref.at[pl.ds(0, 1)],
            buf_ref.at[slot, pl.ds(j, 1)],
            sem_ref.at[slot, j],
        ).wait()

    # Lane-dense (tok_block, D) store; Pallas pipelines it back to HBM.
    out_ref[...] = buf_ref[slot]


def embed_lookup(xs, table, *, tok_block=None):
    """xs: (B, T) int ids; table: (V, D) float32.  Returns (B, T, D)."""
    B, T = xs.shape
    V, D = table.shape
    n_tok = B * T

    if tok_block is None:
        # Amortize per-grid-step overhead and keep many row DMAs in flight,
        # while bounding padding waste for tiny inputs and VMEM for huge D.
        tok_block = min(64, max(8, ((n_tok + 7) // 8) * 8))

    ids = jnp.clip(xs.reshape(-1).astype(jnp.int32), 0, V - 1)  # guard OOB DMA
    num_blocks = pl.cdiv(n_tok, tok_block)
    n_pad = num_blocks * tok_block
    if n_pad != n_tok:
        ids = jnp.pad(ids, (0, n_pad - n_tok))  # padded ids -> row 0; sliced off below

    out = pl.pallas_call(
        functools.partial(_embed_gather_kernel, tok_block),
        out_shape=jax.ShapeDtypeStruct((n_pad, D), table.dtype),
        grid_spec=pltpu.PrefetchScalarGridSpec(
            num_scalar_prefetch=1,
            grid=(num_blocks,),
            in_specs=[pl.BlockSpec(memory_space=pl.ANY)],            # table stays in HBM
            out_specs=pl.BlockSpec((tok_block, D), lambda i, ids_ref: (i, 0)),
            scratch_shapes=[
                pltpu.VMEM((2, tok_block, D), table.dtype),
                pltpu.SemaphoreType.DMA((2, tok_block)),
            ],
        ),
        compiler_params=pltpu.CompilerParams(
            # cross-iteration DMA prefetch => grid iteration order matters
            dimension_semantics=("arbitrary",),
        ),
    )(ids, table)

    return out[:n_tok].reshape(B, T, D)


def _dropout3d_channelwise(x, p, key):
    """Channel-wise dropout over dim=1 of a (B, T, D) tensor (zero whole
    embedding vectors per token position), scaled by 1/(1-p)."""
    keep = jax.random.bernoulli(key, 1.0 - p, x.shape[:2] + (1,))
    return jnp.where(keep, x / (1.0 - p), jnp.zeros((), x.dtype)).astype(x.dtype)


class EmbedLayerPallas:
    """Pallas equivalent of the PyTorch EmbedLayer forward pass."""

    def __init__(self, num_embeddings, embedding_dim, dropout=0.0,
                 padding_idx=None, key=None):
        self.num_embeddings = num_embeddings
        self.embedding_dim = embedding_dim
        self.dropout = dropout
        self.padding_idx = padding_idx

        # reset_parameters(): orthogonal init, then zero the padding row.
        if key is None:
            key = jax.random.PRNGKey(0)
        weight = jax.nn.initializers.orthogonal()(
            key, (num_embeddings, embedding_dim), jnp.float32)
        if padding_idx is not None:
            weight = weight.at[padding_idx].set(0.0)
        self.weight = weight
        # NOTE: scale_grad_by_freq / freeze only affect gradients, not forward.

    def __call__(self, xs, training=False, dropout_key=None):
        """xs: (B, T) int token ids -> (B, T, embedding_dim)."""
        embeds = embed_lookup(xs, self.weight)
        if training and self.dropout > 0.0:
            # TODO(synk): PyTorch Dropout3d's exact handling of a 3-D input is
            # version-dependent; this implements channel-wise dropout over
            # dim=1 (whole token vectors). dropout=0.0 / eval is exact identity.
            if dropout_key is None:
                dropout_key = jax.random.PRNGKey(0)
            embeds = _dropout3d_channelwise(embeds, self.dropout, dropout_key)
        return embeds


if __name__ == "__main__":
    B, T = 2, 8
    num_embeddings = 64
    embedding_dim = 128      # lane-dense output tiles (multiple of 128 lanes)
    padding_idx = 0

    key = jax.random.PRNGKey(0)
    k_w, k_ids = jax.random.split(key)

    model = EmbedLayerPallas(num_embeddings, embedding_dim, dropout=0.0,
                             padding_idx=padding_idx, key=k_w)

    xs = jax.random.randint(k_ids, (B, T), 0, num_embeddings, dtype=jnp.int32)
    xs = xs.at[1, 5:].set(padding_idx)   # simulate padded positions

    embeds = model(xs)
    jax.block_until_ready(embeds)

    assert embeds.shape == (B, T, embedding_dim)
    # Reference check against a plain JAX gather.
    ref = model.weight[xs]
    assert jnp.allclose(embeds, ref), "kernel output != reference gather"
    # padding_idx rows must be all zeros.
    assert jnp.allclose(embeds[1, 5:], 0.0)

    print("KERNEL_OK")
</pallas_src>

<mosaic_0001>
module attributes {stable_mosaic.version = 11 : i64} {
  func.func @_embed_gather_kernel(%arg0: i32, %arg1: memref<16xi32, #tpu.memory_space<smem>>, %arg2: memref<64x128xf32, #tpu.memory_space<any>>, %arg3: memref<16x128xf32, #tpu.memory_space<vmem>>, %arg4: memref<2x16x128xf32, #tpu.memory_space<vmem>>, %arg5: memref<2x16x!tpu.dma_semaphore, #tpu.memory_space<semaphore_mem>>) attributes {dimension_semantics = [#tpu.dimension_semantics<arbitrary>], iteration_bounds = array<i64: 1>, scalar_prefetch = 1 : i64, scratch_operands = 2 : i64, tpu.core_type = #tpu.core_type<tc>, window_params = [{}, {transform_indices = @transform_1, window_bounds = array<i64: 16, 128>}]} {
    %c2_i32 = arith.constant 2 : i32
    %c0_i32 = arith.constant 0 : i32
    %0 = arith.cmpi eq, %c2_i32, %c0_i32 : i32
    %c1_i32 = arith.constant 1 : i32
    %1 = arith.select %0, %c1_i32, %c2_i32 : i32
    %2 = arith.remsi %arg0, %1 : i32
    %c0_i32_0 = arith.constant 0 : i32
    %3 = arith.cmpi ne, %2, %c0_i32_0 : i32
    %c0_i32_1 = arith.constant 0 : i32
    %4 = arith.cmpi slt, %2, %c0_i32_1 : i32
    %c0_i32_2 = arith.constant 0 : i32
    %5 = arith.cmpi slt, %1, %c0_i32_2 : i32
    %6 = arith.xori %4, %5 : i1
    %7 = arith.andi %6, %3 : i1
    %8 = arith.addi %2, %1 : i32
    %9 = arith.select %7, %8, %2 : i32
    %c0_i32_3 = arith.constant 0 : i32
    %10 = arith.cmpi eq, %arg0, %c0_i32_3 : i32
    %11 = arith.extui %10 : i1 to i32
    %c0_i32_4 = arith.constant 0 : i32
    %12 = arith.cmpi ne, %11, %c0_i32_4 : i32
    scf.if %12 {
      %c0_78 = arith.constant 0 : index
      %101 = memref.load %arg1[%c0_78] : memref<16xi32, #tpu.memory_space<smem>>
      %c0_i32_79 = arith.constant 0 : i32
      %c0_i32_80 = arith.constant 0 : i32
      %c0_i32_81 = arith.constant 0 : i32
      %c0_i32_82 = arith.constant 0 : i32
      %102 = tpu.memref_slice %arg2[%101, %c0_i32_82] : memref<64x128xf32, #tpu.memory_space<any>> -> memref<1x128xf32, #tpu.memory_space<any>>
      %c0_i32_83 = arith.constant 0 : i32
      %c0_i32_84 = arith.constant 0 : i32
      %103 = tpu.memref_slice %arg4[%c0_i32_79, %c0_i32_83, %c0_i32_84] : memref<2x16x128xf32, #tpu.memory_space<vmem>> -> memref<1x1x128xf32, #tpu.memory_space<vmem>>
      %104 = tpu.memref_squeeze %103 : memref<1x1x128xf32, #tpu.memory_space<vmem>> -> memref<1x128xf32, #tpu.memory_space<vmem>>
      %105 = tpu.memref_slice %arg5[%c0_i32_80, %c0_i32_81] : memref<2x16x!tpu.dma_semaphore, #tpu.memory_space<semaphore_mem>> -> memref<1x1x!tpu.dma_semaphore, #tpu.memory_space<semaphore_mem>>
      %106 = tpu.memref_squeeze %105 : memref<1x1x!tpu.dma_semaphore, #tpu.memory_space<semaphore_mem>> -> memref<!tpu.dma_semaphore, #tpu.memory_space<semaphore_mem>>
      tpu.enqueue_dma source(%102 : memref<1x128xf32, #tpu.memory_space<any>>) target(%104 : memref<1x128xf32, #tpu.memory_space<vmem>>) target_semaphore(%106 : memref<!tpu.dma_semaphore, #tpu.memory_space<semaphore_mem>>)
      %c1 = arith.constant 1 : index
      %107 = memref.load %arg1[%c1] : memref<16xi32, #tpu.memory_space<smem>>
      %c0_i32_85 = arith.constant 0 : i32
      %c0_i32_86 = arith.constant 0 : i32
      %c1_i32_87 = arith.constant 1 : i32
      %c0_i32_88 = arith.constant 0 : i32
      %108 = tpu.memref_slice %arg2[%107, %c0_i32_88] : memref<64x128xf32, #tpu.memory_space<any>> -> memref<1x128xf32, #tpu.memory_space<any>>
      %c1_i32_89 = arith.constant 1 : i32
      %c0_i32_90 = arith.constant 0 : i32
      %109 = tpu.memref_slice %arg4[%c0_i32_85, %c1_i32_89, %c0_i32_90] : memref<2x16x128xf32, #tpu.memory_space<vmem>> -> memref<1x1x128xf32, #tpu.memory_space<vmem>>
      %110 = tpu.memref_squeeze %109 : memref<1x1x128xf32, #tpu.memory_space<vmem>> -> memref<1x128xf32, #tpu.memory_space<vmem>>
      %111 = tpu.memref_slice %arg5[%c0_i32_86, %c1_i32_87] : memref<2x16x!tpu.dma_semaphore, #tpu.memory_space<semaphore_mem>> -> memref<1x1x!tpu.dma_semaphore, #tpu.memory_space<semaphore_mem>>
      %112 = tpu.memref_squeeze %111 : memref<1x1x!tpu.dma_semaphore, #tpu.memory_space<semaphore_mem>> -> memref<!tpu.dma_semaphore, #tpu.memory_space<semaphore_mem>>
      tpu.enqueue_dma source(%108 : memref<1x128xf32, #tpu.memory_space<any>>) target(%110 : memref<1x128xf32, #tpu.memory_space<vmem>>) target_semaphore(%112 : memref<!tpu.dma_semaphore, #tpu.memory_space<semaphore_mem>>)
      %c2 = arith.constant 2 : index
      %113 = memref.load %arg1[%c2] : memref<16xi32, #tpu.memory_space<smem>>
      %c0_i32_91 = arith.constant 0 : i32
      %c0_i32_92 = arith.constant 0 : i32
      %c2_i32_93 = arith.constant 2 : i32
      %c0_i32_94 = arith.constant 0 : i32
      %114 = tpu.memref_slice %arg2[%113, %c0_i32_94] : memref<64x128xf32, #tpu.memory_space<any>> -> memref<1x128xf32, #tpu.memory_space<any>>
      %c2_i32_95 = arith.constant 2 : i32
      %c0_i32_96 = arith.constant 0 : i32
      %115 = tpu.memref_slice %arg4[%c0_i32_91, %c2_i32_95, %c0_i32_96] : memref<2x16x128xf32, #tpu.memory_space<vmem>> -> memref<1x1x128xf32, #tpu.memory_space<vmem>>
      %116 = tpu.memref_squeeze %115 : memref<1x1x128xf32, #tpu.memory_space<vmem>> -> memref<1x128xf32, #tpu.memory_space<vmem>>
      %117 = tpu.memref_slice %arg5[%c0_i32_92, %c2_i32_93] : memref<2x16x!tpu.dma_semaphore, #tpu.memory_space<semaphore_mem>> -> memref<1x1x!tpu.dma_semaphore, #tpu.memory_space<semaphore_mem>>
      %118 = tpu.memref_squeeze %117 : memref<1x1x!tpu.dma_semaphore, #tpu.memory_space<semaphore_mem>> -> memref<!tpu.dma_semaphore, #tpu.memory_space<semaphore_mem>>
      tpu.enqueue_dma source(%114 : memref<1x128xf32, #tpu.memory_space<any>>) target(%116 : memref<1x128xf32, #tpu.memory_space<vmem>>) target_semaphore(%118 : memref<!tpu.dma_semaphore, #tpu.memory_space<semaphore_mem>>)
      %c3 = arith.constant 3 : index
      %119 = memref.load %arg1[%c3] : memref<16xi32, #tpu.memory_space<smem>>
      %c0_i32_97 = arith.constant 0 : i32
      %c0_i32_98 = arith.constant 0 : i32
      %c3_i32_99 = arith.constant 3 : i32
      %c0_i32_100 = arith.constant 0 : i32
      %120 = tpu.memref_slice %arg2[%119, %c0_i32_100] : memref<64x128xf32, #tpu.memory_space<any>> -> memref<1x128xf32, #tpu.memory_space<any>>
      %c3_i32_101 = arith.constant 3 : i32
      %c0_i32_102 = arith.constant 0 : i32
      %121 = tpu.memref_slice %arg4[%c0_i32_97, %c3_i32_101, %c0_i32_102] : memref<2x16x128xf32, #tpu.memory_space<vmem>> -> memref<1x1x128xf32, #tpu.memory_space<vmem>>
      %122 = tpu.memref_squeeze %121 : memref<1x1x128xf32, #tpu.memory_space<vmem>> -> memref<1x128xf32, #tpu.memory_space<vmem>>
      %123 = tpu.memref_slice %arg5[%c0_i32_98, %c3_i32_99] : memref<2x16x!tpu.dma_semaphore, #tpu.memory_space<semaphore_mem>> -> memref<1x1x!tpu.dma_semaphore, #tpu.memory_space<semaphore_mem>>
      %124 = tpu.memref_squeeze %123 : memref<1x1x!tpu.dma_semaphore, #tpu.memory_space<semaphore_mem>> -> memref<!tpu.dma_semaphore, #tpu.memory_space<semaphore_mem>>
      tpu.enqueue_dma source(%120 : memref<1x128xf32, #tpu.memory_space<any>>) target(%122 : memref<1x128xf32, #tpu.memory_space<vmem>>) target_semaphore(%124 : memref<!tpu.dma_semaphore, #tpu.memory_space<semaphore_mem>>)
      %c4 = arith.constant 4 : index
      %125 = memref.load %arg1[%c4] : memref<16xi32, #tpu.memory_space<smem>>
      %c0_i32_103 = arith.constant 0 : i32
      %c0_i32_104 = arith.constant 0 : i32
      %c4_i32_105 = arith.constant 4 : i32
      %c0_i32_106 = arith.constant 0 : i32
      %126 = tpu.memref_slice %arg2[%125, %c0_i32_106] : memref<64x128xf32, #tpu.memory_space<any>> -> memref<1x128xf32, #tpu.memory_space<any>>
      %c4_i32_107 = arith.constant 4 : i32
      %c0_i32_108 = arith.constant 0 : i32
      %127 = tpu.memref_slice %arg4[%c0_i32_103, %c4_i32_107, %c0_i32_108] : memref<2x16x128xf32, #tpu.memory_space<vmem>> -> memref<1x1x128xf32, #tpu.memory_space<vmem>>
      %128 = tpu.memref_squeeze %127 : memref<1x1x128xf32, #tpu.memory_space<vmem>> -> memref<1x128xf32, #tpu.memory_space<vmem>>
      %129 = tpu.memref_slice %arg5[%c0_i32_104, %c4_i32_105] : memref<2x16x!tpu.dma_semaphore, #tpu.memory_space<semaphore_mem>> -> memref<1x1x!tpu.dma_semaphore, #tpu.memory_space<semaphore_mem>>
      %130 = tpu.memref_squeeze %129 : memref<1x1x!tpu.dma_semaphore, #tpu.memory_space<semaphore_mem>> -> memref<!tpu.dma_semaphore, #tpu.memory_space<semaphore_mem>>
      tpu.enqueue_dma source(%126 : memref<1x128xf32, #tpu.memory_space<any>>) target(%128 : memref<1x128xf32, #tpu.memory_space<vmem>>) target_semaphore(%130 : memref<!tpu.dma_semaphore, #tpu.memory_space<semaphore_mem>>)
      %c5 = arith.constant 5 : index
      %131 = memref.load %arg1[%c5] : memref<16xi32, #tpu.memory_space<smem>>
      %c0_i32_109 = arith.constant 0 : i32
      %c0_i32_110 = arith.constant 0 : i32
      %c5_i32_111 = arith.constant 5 : i32
      %c0_i32_112 = arith.constant 0 : i32
      %132 = tpu.memref_slice %arg2[%131, %c0_i32_112] : memref<64x128xf32, #tpu.memory_space<any>> -> memref<1x128xf32, #tpu.memory_space<any>>
      %c5_i32_113 = arith.constant 5 : i32
      %c0_i32_114 = arith.constant 0 : i32
      %133 = tpu.memref_slice %arg4[%c0_i32_109, %c5_i32_113, %c0_i32_114] : memref<2x16x128xf32, #tpu.memory_space<vmem>> -> memref<1x1x128xf32, #tpu.memory_space<vmem>>
      %134 = tpu.memref_squeeze %133 : memref<1x1x128xf32, #tpu.memory_space<vmem>> -> memref<1x128xf32, #tpu.memory_space<vmem>>
      %135 = tpu.memref_slice %arg5[%c0_i32_110, %c5_i32_111] : memref<2x16x!tpu.dma_semaphore, #tpu.memory_space<semaphore_mem>> -> memref<1x1x!tpu.dma_semaphore, #tpu.memory_space<semaphore_mem>>
      %136 = tpu.memref_squeeze %135 : memref<1x1x!tpu.dma_semaphore, #tpu.memory_space<semaphore_mem>> -> memref<!tpu.dma_semaphore, #tpu.memory_space<semaphore_mem>>
      tpu.enqueue_dma source(%132 : memref<1x128xf32, #tpu.memory_space<any>>) target(%134 : memref<1x128xf32, #tpu.memory_space<vmem>>) target_semaphore(%136 : memref<!tpu.dma_semaphore, #tpu.memory_space<semaphore_mem>>)
      %c6 = arith.constant 6 : index
      %137 = memref.load %arg1[%c6] : memref<16xi32, #tpu.memory_space<smem>>
      %c0_i32_115 = arith.constant 0 : i32
      %c0_i32_116 = arith.constant 0 : i32
      %c6_i32_117 = arith.constant 6 : i32
      %c0_i32_118 = arith.constant 0 : i32
      %138 = tpu.memref_slice %arg2[%137, %c0_i32_118] : memref<64x128xf32, #tpu.memory_space<any>> -> memref<1x128xf32, #tpu.memory_space<any>>
      %c6_i32_119 = arith.constant 6 : i32
      %c0_i32_120 = arith.constant 0 : i32
      %139 = tpu.memref_slice %arg4[%c0_i32_115, %c6_i32_119, %c0_i32_120] : memref<2x16x128xf32, #tpu.memory_space<vmem>> -> memref<1x1x128xf32, #tpu.memory_space<vmem>>
      %140 = tpu.memref_squeeze %139 : memref<1x1x128xf32, #tpu.memory_space<vmem>> -> memref<1x128xf32, #tpu.memory_space<vmem>>
      %141 = tpu.memref_slice %arg5[%c0_i32_116, %c6_i32_117] : memref<2x16x!tpu.dma_semaphore, #tpu.memory_space<semaphore_mem>> -> memref<1x1x!tpu.dma_semaphore, #tpu.memory_space<semaphore_mem>>
      %142 = tpu.memref_squeeze %141 : memref<1x1x!tpu.dma_semaphore, #tpu.memory_space<semaphore_mem>> -> memref<!tpu.dma_semaphore, #tpu.memory_space<semaphore_mem>>
      tpu.enqueue_dma source(%138 : memref<1x128xf32, #tpu.memory_space<any>>) target(%140 : memref<1x128xf32, #tpu.memory_space<vmem>>) target_semaphore(%142 : memref<!tpu.dma_semaphore, #tpu.memory_space<semaphore_mem>>)
      %c7 = arith.constant 7 : index
      %143 = memref.load %arg1[%c7] : memref<16xi32, #tpu.memory_space<smem>>
      %c0_i32_121 = arith.constant 0 : i32
      %c0_i32_122 = arith.constant 0 : i32
      %c7_i32_123 = arith.constant 7 : i32
      %c0_i32_124 = arith.constant 0 : i32
      %144 = tpu.memref_slice %arg2[%143, %c0_i32_124] : memref<64x128xf32, #tpu.memory_space<any>> -> memref<1x128xf32, #tpu.memory_space<any>>
      %c7_i32_125 = arith.constant 7 : i32
      %c0_i32_126 = arith.constant 0 : i32
      %145 = tpu.memref_slice %arg4[%c0_i32_121, %c7_i32_125, %c0_i32_126] : memref<2x16x128xf32, #tpu.memory_space<vmem>> -> memref<1x1x128xf32, #tpu.memory_space<vmem>>
      %146 = tpu.memref_squeeze %145 : memref<1x1x128xf32, #tpu.memory_space<vmem>> -> memref<1x128xf32, #tpu.memory_space<vmem>>
      %147 = tpu.memref_slice %arg5[%c0_i32_122, %c7_i32_123] : memref<2x16x!tpu.dma_semaphore, #tpu.memory_space<semaphore_mem>> -> memref<1x1x!tpu.dma_semaphore, #tpu.memory_space<semaphore_mem>>
      %148 = tpu.memref_squeeze %147 : memref<1x1x!tpu.dma_semaphore, #tpu.memory_space<semaphore_mem>> -> memref<!tpu.dma_semaphore, #tpu.memory_space<semaphore_mem>>
      tpu.enqueue_dma source(%144 : memref<1x128xf32, #tpu.memory_space<any>>) target(%146 : memref<1x128xf32, #tpu.memory_space<vmem>>) target_semaphore(%148 : memref<!tpu.dma_semaphore, #tpu.memory_space<semaphore_mem>>)
      %c8 = arith.constant 8 : index
      %149 = memref.load %arg1[%c8] : memref<16xi32, #tpu.memory_space<smem>>
      %c0_i32_127 = arith.constant 0 : i32
      %c0_i32_128 = arith.constant 0 : i32
      %c8_i32_129 = arith.constant 8 : i32
      %c0_i32_130 = arith.constant 0 : i32
      %150 = tpu.memref_slice %arg2[%149, %c0_i32_130] : memref<64x128xf32, #tpu.memory_space<any>> -> memref<1x128xf32, #tpu.memory_space<any>>
      %c8_i32_131 = arith.constant 8 : i32
      %c0_i32_132 = arith.constant 0 : i32
      %151 = tpu.memref_slice %arg4[%c0_i32_127, %c8_i32_131, %c0_i32_132] : memref<2x16x128xf32, #tpu.memory_space<vmem>> -> memref<1x1x128xf32, #tpu.memory_space<vmem>>
      %152 = tpu.memref_squeeze %151 : memref<1x1x128xf32, #tpu.memory_space<vmem>> -> memref<1x128xf32, #tpu.memory_space<vmem>>
      %153 = tpu.memref_slice %arg5[%c0_i32_128, %c8_i32_129] : memref<2x16x!tpu.dma_semaphore, #tpu.memory_space<semaphore_mem>> -> memref<1x1x!tpu.dma_semaphore, #tpu.memory_space<semaphore_mem>>
      %154 = tpu.memref_squeeze %153 : memref<1x1x!tpu.dma_semaphore, #tpu.memory_space<semaphore_mem>> -> memref<!tpu.dma_semaphore, #tpu.memory_space<semaphore_mem>>
      tpu.enqueue_dma source(%150 : memref<1x128xf32, #tpu.memory_space<any>>) target(%152 : memref<1x128xf32, #tpu.memory_space<vmem>>) target_semaphore(%154 : memref<!tpu.dma_semaphore, #tpu.memory_space<semaphore_mem>>)
      %c9 = arith.constant 9 : index
      %155 = memref.load %arg1[%c9] : memref<16xi32, #tpu.memory_space<smem>>
      %c0_i32_133 = arith.constant 0 : i32
      %c0_i32_134 = arith.constant 0 : i32
      %c9_i32_135 = arith.constant 9 : i32
      %c0_i32_136 = arith.constant 0 : i32
      %156 = tpu.memref_slice %arg2[%155, %c0_i32_136] : memref<64x128xf32, #tpu.memory_space<any>> -> memref<1x128xf32, #tpu.memory_space<any>>
      %c9_i32_137 = arith.constant 9 : i32
      %c0_i32_138 = arith.constant 0 : i32
      %157 = tpu.memref_slice %arg4[%c0_i32_133, %c9_i32_137, %c0_i32_138] : memref<2x16x128xf32, #tpu.memory_space<vmem>> -> memref<1x1x128xf32, #tpu.memory_space<vmem>>
      %158 = tpu.memref_squeeze %157 : memref<1x1x128xf32, #tpu.memory_space<vmem>> -> memref<1x128xf32, #tpu.memory_space<vmem>>
      %159 = tpu.memref_slice %arg5[%c0_i32_134, %c9_i32_135] : memref<2x16x!tpu.dma_semaphore, #tpu.memory_space<semaphore_mem>> -> memref<1x1x!tpu.dma_semaphore, #tpu.memory_space<semaphore_mem>>
      %160 = tpu.memref_squeeze %159 : memref<1x1x!tpu.dma_semaphore, #tpu.memory_space<semaphore_mem>> -> memref<!tpu.dma_semaphore, #tpu.memory_space<semaphore_mem>>
      tpu.enqueue_dma source(%156 : memref<1x128xf32, #tpu.memory_space<any>>) target(%158 : memref<1x128xf32, #tpu.memory_space<vmem>>) target_semaphore(%160 : memref<!tpu.dma_semaphore, #tpu.memory_space<semaphore_mem>>)
      %c10 = arith.constant 10 : index
      %161 = memref.load %arg1[%c10] : memref<16xi32, #tpu.memory_space<smem>>
      %c0_i32_139 = arith.constant 0 : i32
      %c0_i32_140 = arith.constant 0 : i32
      %c10_i32_141 = arith.constant 10 : i32
      %c0_i32_142 = arith.constant 0 : i32
      %162 = tpu.memref_slice %arg2[%161, %c0_i32_142] : memref<64x128xf32, #tpu.memory_space<any>> -> memref<1x128xf32, #tpu.memory_space<any>>
      %c10_i32_143 = arith.constant 10 : i32
      %c0_i32_144 = arith.constant 0 : i32
      %163 = tpu.memref_slice %arg4[%c0_i32_139, %c10_i32_143, %c0_i32_144] : memref<2x16x128xf32, #tpu.memory_space<vmem>> -> memref<1x1x128xf32, #tpu.memory_space<vmem>>
      %164 = tpu.memref_squeeze %163 : memref<1x1x128xf32, #tpu.memory_space<vmem>> -> memref<1x128xf32, #tpu.memory_space<vmem>>
      %165 = tpu.memref_slice %arg5[%c0_i32_140, %c10_i32_141] : memref<2x16x!tpu.dma_semaphore, #tpu.memory_space<semaphore_mem>> -> memref<1x1x!tpu.dma_semaphore, #tpu.memory_space<semaphore_mem>>
      %166 = tpu.memref_squeeze %165 : memref<1x1x!tpu.dma_semaphore, #tpu.memory_space<semaphore_mem>> -> memref<!tpu.dma_semaphore, #tpu.memory_space<semaphore_mem>>
      tpu.enqueue_dma source(%162 : memref<1x128xf32, #tpu.memory_space<any>>) target(%164 : memref<1x128xf32, #tpu.memory_space<vmem>>) target_semaphore(%166 : memref<!tpu.dma_semaphore, #tpu.memory_space<semaphore_mem>>)
      %c11 = arith.constant 11 : index
      %167 = memref.load %arg1[%c11] : memref<16xi32, #tpu.memory_space<smem>>
      %c0_i32_145 = arith.constant 0 : i32
      %c0_i32_146 = arith.constant 0 : i32
      %c11_i32_147 = arith.constant 11 : i32
      %c0_i32_148 = arith.constant 0 : i32
      %168 = tpu.memref_slice %arg2[%167, %c0_i32_148] : memref<64x128xf32, #tpu.memory_space<any>> -> memref<1x128xf32, #tpu.memory_space<any>>
      %c11_i32_149 = arith.constant 11 : i32
      %c0_i32_150 = arith.constant 0 : i32
      %169 = tpu.memref_slice %arg4[%c0_i32_145, %c11_i32_149, %c0_i32_150] : memref<2x16x128xf32, #tpu.memory_space<vmem>> -> memref<1x1x128xf32, #tpu.memory_space<vmem>>
      %170 = tpu.memref_squeeze %169 : memref<1x1x128xf32, #tpu.memory_space<vmem>> -> memref<1x128xf32, #tpu.memory_space<vmem>>
      %171 = tpu.memref_slice %arg5[%c0_i32_146, %c11_i32_147] : memref<2x16x!tpu.dma_semaphore, #tpu.memory_space<semaphore_mem>> -> memref<1x1x!tpu.dma_semaphore, #tpu.memory_space<semaphore_mem>>
      %172 = tpu.memref_squeeze %171 : memref<1x1x!tpu.dma_semaphore, #tpu.memory_space<semaphore_mem>> -> memref<!tpu.dma_semaphore, #tpu.memory_space<semaphore_mem>>
      tpu.enqueue_dma source(%168 : memref<1x128xf32, #tpu.memory_space<any>>) target(%170 : memref<1x128xf32, #tpu.memory_space<vmem>>) target_semaphore(%172 : memref<!tpu.dma_semaphore, #tpu.memory_space<semaphore_mem>>)
      %c12 = arith.constant 12 : index
      %173 = memref.load %arg1[%c12] : memref<16xi32, #tpu.memory_space<smem>>
      %c0_i32_151 = arith.constant 0 : i32
      %c0_i32_152 = arith.constant 0 : i32
      %c12_i32_153 = arith.constant 12 : i32
      %c0_i32_154 = arith.constant 0 : i32
      %174 = tpu.memref_slice %arg2[%173, %c0_i32_154] : memref<64x128xf32, #tpu.memory_space<any>> -> memref<1x128xf32, #tpu.memory_space<any>>
      %c12_i32_155 = arith.constant 12 : i32
      %c0_i32_156 = arith.constant 0 : i32
      %175 = tpu.memref_slice %arg4[%c0_i32_151, %c12_i32_155, %c0_i32_156] : memref<2x16x128xf32, #tpu.memory_space<vmem>> -> memref<1x1x128xf32, #tpu.memory_space<vmem>>
      %176 = tpu.memref_squeeze %175 : memref<1x1x128xf32, #tpu.memory_space<vmem>> -> memref<1x128xf32, #tpu.memory_space<vmem>>
      %177 = tpu.memref_slice %arg5[%c0_i32_152, %c12_i32_153] : memref<2x16x!tpu.dma_semaphore, #tpu.memory_space<semaphore_mem>> -> memref<1x1x!tpu.dma_semaphore, #tpu.memory_space<semaphore_mem>>
      %178 = tpu.memref_squeeze %177 : memref<1x1x!tpu.dma_semaphore, #tpu.memory_space<semaphore_mem>> -> memref<!tpu.dma_semaphore, #tpu.memory_space<semaphore_mem>>
      tpu.enqueue_dma source(%174 : memref<1x128xf32, #tpu.memory_space<any>>) target(%176 : memref<1x128xf32, #tpu.memory_space<vmem>>) target_semaphore(%178 : memref<!tpu.dma_semaphore, #tpu.memory_space<semaphore_mem>>)
      %c13 = arith.constant 13 : index
      %179 = memref.load %arg1[%c13] : memref<16xi32, #tpu.memory_space<smem>>
      %c0_i32_157 = arith.constant 0 : i32
      %c0_i32_158 = arith.constant 0 : i32
      %c13_i32_159 = arith.constant 13 : i32
      %c0_i32_160 = arith.constant 0 : i32
      %180 = tpu.memref_slice %arg2[%179, %c0_i32_160] : memref<64x128xf32, #tpu.memory_space<any>> -> memref<1x128xf32, #tpu.memory_space<any>>
      %c13_i32_161 = arith.constant 13 : i32
      %c0_i32_162 = arith.constant 0 : i32
      %181 = tpu.memref_slice %arg4[%c0_i32_157, %c13_i32_161, %c0_i32_162] : memref<2x16x128xf32, #tpu.memory_space<vmem>> -> memref<1x1x128xf32, #tpu.memory_space<vmem>>
      %182 = tpu.memref_squeeze %181 : memref<1x1x128xf32, #tpu.memory_space<vmem>> -> memref<1x128xf32, #tpu.memory_space<vmem>>
      %183 = tpu.memref_slice %arg5[%c0_i32_158, %c13_i32_159] : memref<2x16x!tpu.dma_semaphore, #tpu.memory_space<semaphore_mem>> -> memref<1x1x!tpu.dma_semaphore, #tpu.memory_space<semaphore_mem>>
      %184 = tpu.memref_squeeze %183 : memref<1x1x!tpu.dma_semaphore, #tpu.memory_space<semaphore_mem>> -> memref<!tpu.dma_semaphore, #tpu.memory_space<semaphore_mem>>
      tpu.enqueue_dma source(%180 : memref<1x128xf32, #tpu.memory_space<any>>) target(%182 : memref<1x128xf32, #tpu.memory_space<vmem>>) target_semaphore(%184 : memref<!tpu.dma_semaphore, #tpu.memory_space<semaphore_mem>>)
      %c14 = arith.constant 14 : index
      %185 = memref.load %arg1[%c14] : memref<16xi32, #tpu.memory_space<smem>>
      %c0_i32_163 = arith.constant 0 : i32
      %c0_i32_164 = arith.constant 0 : i32
      %c14_i32_165 = arith.constant 14 : i32
      %c0_i32_166 = arith.constant 0 : i32
      %186 = tpu.memref_slice %arg2[%185, %c0_i32_166] : memref<64x128xf32, #tpu.memory_space<any>> -> memref<1x128xf32, #tpu.memory_space<any>>
      %c14_i32_167 = arith.constant 14 : i32
      %c0_i32_168 = arith.constant 0 : i32
      %187 = tpu.memref_slice %arg4[%c0_i32_163, %c14_i32_167, %c0_i32_168] : memref<2x16x128xf32, #tpu.memory_space<vmem>> -> memref<1x1x128xf32, #tpu.memory_space<vmem>>
      %188 = tpu.memref_squeeze %187 : memref<1x1x128xf32, #tpu.memory_space<vmem>> -> memref<1x128xf32, #tpu.memory_space<vmem>>
      %189 = tpu.memref_slice %arg5[%c0_i32_164, %c14_i32_165] : memref<2x16x!tpu.dma_semaphore, #tpu.memory_space<semaphore_mem>> -> memref<1x1x!tpu.dma_semaphore, #tpu.memory_space<semaphore_mem>>
      %190 = tpu.memref_squeeze %189 : memref<1x1x!tpu.dma_semaphore, #tpu.memory_space<semaphore_mem>> -> memref<!tpu.dma_semaphore, #tpu.memory_space<semaphore_mem>>
      tpu.enqueue_dma source(%186 : memref<1x128xf32, #tpu.memory_space<any>>) target(%188 : memref<1x128xf32, #tpu.memory_space<vmem>>) target_semaphore(%190 : memref<!tpu.dma_semaphore, #tpu.memory_space<semaphore_mem>>)
      %c15 = arith.constant 15 : index
      %191 = memref.load %arg1[%c15] : memref<16xi32, #tpu.memory_space<smem>>
      %c0_i32_169 = arith.constant 0 : i32
      %c0_i32_170 = arith.constant 0 : i32
      %c15_i32_171 = arith.constant 15 : i32
      %c0_i32_172 = arith.constant 0 : i32
      %192 = tpu.memref_slice %arg2[%191, %c0_i32_172] : memref<64x128xf32, #tpu.memory_space<any>> -> memref<1x128xf32, #tpu.memory_space<any>>
      %c15_i32_173 = arith.constant 15 : i32
      %c0_i32_174 = arith.constant 0 : i32
      %193 = tpu.memref_slice %arg4[%c0_i32_169, %c15_i32_173, %c0_i32_174] : memref<2x16x128xf32, #tpu.memory_space<vmem>> -> memref<1x1x128xf32, #tpu.memory_space<vmem>>
      %194 = tpu.memref_squeeze %193 : memref<1x1x128xf32, #tpu.memory_space<vmem>> -> memref<1x128xf32, #tpu.memory_space<vmem>>
      %195 = tpu.memref_slice %arg5[%c0_i32_170, %c15_i32_171] : memref<2x16x!tpu.dma_semaphore, #tpu.memory_space<semaphore_mem>> -> memref<1x1x!tpu.dma_semaphore, #tpu.memory_space<semaphore_mem>>
      %196 = tpu.memref_squeeze %195 : memref<1x1x!tpu.dma_semaphore, #tpu.memory_space<semaphore_mem>> -> memref<!tpu.dma_semaphore, #tpu.memory_space<semaphore_mem>>
      tpu.enqueue_dma source(%192 : memref<1x128xf32, #tpu.memory_space<any>>) target(%194 : memref<1x128xf32, #tpu.memory_space<vmem>>) target_semaphore(%196 : memref<!tpu.dma_semaphore, #tpu.memory_space<semaphore_mem>>)
    } else {
    }
    %c1_i32_5 = arith.constant 1 : i32
    %13 = arith.addi %arg0, %c1_i32_5 : i32
    %c1_i32_6 = arith.constant 1 : i32
    %14 = arith.cmpi slt, %13, %c1_i32_6 : i32
    %15 = arith.extui %14 : i1 to i32
    %c0_i32_7 = arith.constant 0 : i32
    %16 = arith.cmpi ne, %15, %c0_i32_7 : i32
    scf.if %16 {
      %c1_i32_78 = arith.constant 1 : i32
      %101 = arith.addi %arg0, %c1_i32_78 : i32
      %c1_i32_79 = arith.constant 1 : i32
      %102 = arith.subi %c1_i32_79, %9 : i32
      %c16_i32 = arith.constant 16 : i32
      %103 = arith.muli %101, %c16_i32 : i32
      %c0_i32_80 = arith.constant 0 : i32
      %104 = arith.addi %103, %c0_i32_80 : i32
      %105 = arith.index_cast %104 : i32 to index
      %106 = memref.load %arg1[%105] : memref<16xi32, #tpu.memory_space<smem>>
      %c0_i32_81 = arith.constant 0 : i32
      %c0_i32_82 = arith.constant 0 : i32
      %107 = tpu.memref_slice %arg2[%106, %c0_i32_82] : memref<64x128xf32, #tpu.memory_space<any>> -> memref<1x128xf32, #tpu.memory_space<any>>
      %c0_i32_83 = arith.constant 0 : i32
      %c0_i32_84 = arith.constant 0 : i32
      %108 = tpu.memref_slice %arg4[%102, %c0_i32_83, %c0_i32_84] : memref<2x16x128xf32, #tpu.memory_space<vmem>> -> memref<1x1x128xf32, #tpu.memory_space<vmem>>
      %109 = tpu.memref_squeeze %108 : memref<1x1x128xf32, #tpu.memory_space<vmem>> -> memref<1x128xf32, #tpu.memory_space<vmem>>
      %110 = tpu.memref_slice %arg5[%102, %c0_i32_81] : memref<2x16x!tpu.dma_semaphore, #tpu.memory_space<semaphore_mem>> -> memref<1x1x!tpu.dma_semaphore, #tpu.memory_space<semaphore_mem>>
      %111 = tpu.memref_squeeze %110 : memref<1x1x!tpu.dma_semaphore, #tpu.memory_space<semaphore_mem>> -> memref<!tpu.dma_semaphore, #tpu.memory_space<semaphore_mem>>
      tpu.enqueue_dma source(%107 : memref<1x128xf32, #tpu.memory_space<any>>) target(%109 : memref<1x128xf32, #tpu.memory_space<vmem>>) target_semaphore(%111 : memref<!tpu.dma_semaphore, #tpu.memory_space<semaphore_mem>>)
      %c16_i32_85 = arith.constant 16 : i32
      %112 = arith.muli %101, %c16_i32_85 : i32
      %c1_i32_86 = arith.constant 1 : i32
      %113 = arith.addi %112, %c1_i32_86 : i32
      %114 = arith.index_cast %113 : i32 to index
      %115 = memref.load %arg1[%114] : memref<16xi32, #tpu.memory_space<smem>>
      %c1_i32_87 = arith.constant 1 : i32
      %c0_i32_88 = arith.constant 0 : i32
      %116 = tpu.memref_slice %arg2[%115, %c0_i32_88] : memref<64x128xf32, #tpu.memory_space<any>> -> memref<1x128xf32, #tpu.memory_space<any>>
      %c1_i32_89 = arith.constant 1 : i32
      %c0_i32_90 = arith.constant 0 : i32
      %117 = tpu.memref_slice %arg4[%102, %c1_i32_89, %c0_i32_90] : memref<2x16x128xf32, #tpu.memory_space<vmem>> -> memref<1x1x128xf32, #tpu.memory_space<vmem>>
      %118 = tpu.memref_squeeze %117 : memref<1x1x128xf32, #tpu.memory_space<vmem>> -> memref<1x128xf32, #tpu.memory_space<vmem>>
      %119 = tpu.memref_slice %arg5[%102, %c1_i32_87] : memref<2x16x!tpu.dma_semaphore, #tpu.memory_space<semaphore_mem>> -> memref<1x1x!tpu.dma_semaphore, #tpu.memory_space<semaphore_mem>>
      %120 = tpu.memref_squeeze %119 : memref<1x1x!tpu.dma_semaphore, #tpu.memory_space<semaphore_mem>> -> memref<!tpu.dma_semaphore, #tpu.memory_space<semaphore_mem>>
      tpu.enqueue_dma source(%116 : memref<1x128xf32, #tpu.memory_space<any>>) target(%118 : memref<1x128xf32, #tpu.memory_space<vmem>>) target_semaphore(%120 : memref<!tpu.dma_semaphore, #tpu.memory_space<semaphore_mem>>)
      %c16_i32_91 = arith.constant 16 : i32
      %121 = arith.muli %101, %c16_i32_91 : i32
      %c2_i32_92 = arith.constant 2 : i32
      %122 = arith.addi %121, %c2_i32_92 : i32
      %123 = arith.index_cast %122 : i32 to index
      %124 = memref.load %arg1[%123] : memref<16xi32, #tpu.memory_space<smem>>
      %c2_i32_93 = arith.constant 2 : i32
      %c0_i32_94 = arith.constant 0 : i32
      %125 = tpu.memref_slice %arg2[%124, %c0_i32_94] : memref<64x128xf32, #tpu.memory_space<any>> -> memref<1x128xf32, #tpu.memory_space<any>>
      %c2_i32_95 = arith.constant 2 : i32
      %c0_i32_96 = arith.constant 0 : i32
      %126 = tpu.memref_slice %arg4[%102, %c2_i32_95, %c0_i32_96] : memref<2x16x128xf32, #tpu.memory_space<vmem>> -> memref<1x1x128xf32, #tpu.memory_space<vmem>>
      %127 = tpu.memref_squeeze %126 : memref<1x1x128xf32, #tpu.memory_space<vmem>> -> memref<1x128xf32, #tpu.memory_space<vmem>>
      %128 = tpu.memref_slice %arg5[%102, %c2_i32_93] : memref<2x16x!tpu.dma_semaphore, #tpu.memory_space<semaphore_mem>> -> memref<1x1x!tpu.dma_semaphore, #tpu.memory_space<semaphore_mem>>
      %129 = tpu.memref_squeeze %128 : memref<1x1x!tpu.dma_semaphore, #tpu.memory_space<semaphore_mem>> -> memref<!tpu.dma_semaphore, #tpu.memory_space<semaphore_mem>>
      tpu.enqueue_dma source(%125 : memref<1x128xf32, #tpu.memory_space<any>>) target(%127 : memref<1x128xf32, #tpu.memory_space<vmem>>) target_semaphore(%129 : memref<!tpu.dma_semaphore, #tpu.memory_space<semaphore_mem>>)
      %c16_i32_97 = arith.constant 16 : i32
      %130 = arith.muli %101, %c16_i32_97 : i32
      %c3_i32_98 = arith.constant 3 : i32
      %131 = arith.addi %130, %c3_i32_98 : i32
      %132 = arith.index_cast %131 : i32 to index
      %133 = memref.load %arg1[%132] : memref<16xi32, #tpu.memory_space<smem>>
      %c3_i32_99 = arith.constant 3 : i32
      %c0_i32_100 = arith.constant 0 : i32
      %134 = tpu.memref_slice %arg2[%133, %c0_i32_100] : memref<64x128xf32, #tpu.memory_space<any>> -> memref<1x128xf32, #tpu.memory_space<any>>
      %c3_i32_101 = arith.constant 3 : i32
      %c0_i32_102 = arith.constant 0 : i32
      %135 = tpu.memref_slice %arg4[%102, %c3_i32_101, %c0_i32_102] : memref<2x16x128xf32, #tpu.memory_space<vmem>> -> memref<1x1x128xf32, #tpu.memory_space<vmem>>
      %136 = tpu.memref_squeeze %135 : memref<1x1x128xf32, #tpu.memory_space<vmem>> -> memref<1x128xf32, #tpu.memory_space<vmem>>
      %137 = tpu.memref_slice %arg5[%102, %c3_i32_99] : memref<2x16x!tpu.dma_semaphore, #tpu.memory_space<semaphore_mem>> -> memref<1x1x!tpu.dma_semaphore, #tpu.memory_space<semaphore_mem>>
      %138 = tpu.memref_squeeze %137 : memref<1x1x!tpu.dma_semaphore, #tpu.memory_space<semaphore_mem>> -> memref<!tpu.dma_semaphore, #tpu.memory_space<semaphore_mem>>
      tpu.enqueue_dma source(%134 : memref<1x128xf32, #tpu.memory_space<any>>) target(%136 : memref<1x128xf32, #tpu.memory_space<vmem>>) target_semaphore(%138 : memref<!tpu.dma_semaphore, #tpu.memory_space<semaphore_mem>>)
      %c16_i32_103 = arith.constant 16 : i32
      %139 = arith.muli %101, %c16_i32_103 : i32
      %c4_i32_104 = arith.constant 4 : i32
      %140 = arith.addi %139, %c4_i32_104 : i32
      %141 = arith.index_cast %140 : i32 to index
      %142 = memref.load %arg1[%141] : memref<16xi32, #tpu.memory_space<smem>>
      %c4_i32_105 = arith.constant 4 : i32
      %c0_i32_106 = arith.constant 0 : i32
      %143 = tpu.memref_slice %arg2[%142, %c0_i32_106] : memref<64x128xf32, #tpu.memory_space<any>> -> memref<1x128xf32, #tpu.memory_space<any>>
      %c4_i32_107 = arith.constant 4 : i32
      %c0_i32_108 = arith.constant 0 : i32
      %144 = tpu.memref_slice %arg4[%102, %c4_i32_107, %c0_i32_108] : memref<2x16x128xf32, #tpu.memory_space<vmem>> -> memref<1x1x128xf32, #tpu.memory_space<vmem>>
      %145 = tpu.memref_squeeze %144 : memref<1x1x128xf32, #tpu.memory_space<vmem>> -> memref<1x128xf32, #tpu.memory_space<vmem>>
      %146 = tpu.memref_slice %arg5[%102, %c4_i32_105] : memref<2x16x!tpu.dma_semaphore, #tpu.memory_space<semaphore_mem>> -> memref<1x1x!tpu.dma_semaphore, #tpu.memory_space<semaphore_mem>>
      %147 = tpu.memref_squeeze %146 : memref<1x1x!tpu.dma_semaphore, #tpu.memory_space<semaphore_mem>> -> memref<!tpu.dma_semaphore, #tpu.memory_space<semaphore_mem>>
      tpu.enqueue_dma source(%143 : memref<1x128xf32, #tpu.memory_space<any>>) target(%145 : memref<1x128xf32, #tpu.memory_space<vmem>>) target_semaphore(%147 : memref<!tpu.dma_semaphore, #tpu.memory_space<semaphore_mem>>)
      %c16_i32_109 = arith.constant 16 : i32
      %148 = arith.muli %101, %c16_i32_109 : i32
      %c5_i32_110 = arith.constant 5 : i32
      %149 = arith.addi %148, %c5_i32_110 : i32
      %150 = arith.index_cast %149 : i32 to index
      %151 = memref.load %arg1[%150] : memref<16xi32, #tpu.memory_space<smem>>
      %c5_i32_111 = arith.constant 5 : i32
      %c0_i32_112 = arith.constant 0 : i32
      %152 = tpu.memref_slice %arg2[%151, %c0_i32_112] : memref<64x128xf32, #tpu.memory_space<any>> -> memref<1x128xf32, #tpu.memory_space<any>>
      %c5_i32_113 = arith.constant 5 : i32
      %c0_i32_114 = arith.constant 0 : i32
      %153 = tpu.memref_slice %arg4[%102, %c5_i32_113, %c0_i32_114] : memref<2x16x128xf32, #tpu.memory_space<vmem>> -> memref<1x1x128xf32, #tpu.memory_space<vmem>>
      %154 = tpu.memref_squeeze %153 : memref<1x1x128xf32, #tpu.memory_space<vmem>> -> memref<1x128xf32, #tpu.memory_space<vmem>>
      %155 = tpu.memref_slice %arg5[%102, %c5_i32_111] : memref<2x16x!tpu.dma_semaphore, #tpu.memory_space<semaphore_mem>> -> memref<1x1x!tpu.dma_semaphore, #tpu.memory_space<semaphore_mem>>
      %156 = tpu.memref_squeeze %155 : memref<1x1x!tpu.dma_semaphore, #tpu.memory_space<semaphore_mem>> -> memref<!tpu.dma_semaphore, #tpu.memory_space<semaphore_mem>>
      tpu.enqueue_dma source(%152 : memref<1x128xf32, #tpu.memory_space<any>>) target(%154 : memref<1x128xf32, #tpu.memory_space<vmem>>) target_semaphore(%156 : memref<!tpu.dma_semaphore, #tpu.memory_space<semaphore_mem>>)
      %c16_i32_115 = arith.constant 16 : i32
      %157 = arith.muli %101, %c16_i32_115 : i32
      %c6_i32_116 = arith.constant 6 : i32
      %158 = arith.addi %157, %c6_i32_116 : i32
      %159 = arith.index_cast %158 : i32 to index
      %160 = memref.load %arg1[%159] : memref<16xi32, #tpu.memory_space<smem>>
      %c6_i32_117 = arith.constant 6 : i32
      %c0_i32_118 = arith.constant 0 : i32
      %161 = tpu.memref_slice %arg2[%160, %c0_i32_118] : memref<64x128xf32, #tpu.memory_space<any>> -> memref<1x128xf32, #tpu.memory_space<any>>
      %c6_i32_119 = arith.constant 6 : i32
      %c0_i32_120 = arith.constant 0 : i32
      %162 = tpu.memref_slice %arg4[%102, %c6_i32_119, %c0_i32_120] : memref<2x16x128xf32, #tpu.memory_space<vmem>> -> memref<1x1x128xf32, #tpu.memory_space<vmem>>
      %163 = tpu.memref_squeeze %162 : memref<1x1x128xf32, #tpu.memory_space<vmem>> -> memref<1x128xf32, #tpu.memory_space<vmem>>
      %164 = tpu.memref_slice %arg5[%102, %c6_i32_117] : memref<2x16x!tpu.dma_semaphore, #tpu.memory_space<semaphore_mem>> -> memref<1x1x!tpu.dma_semaphore, #tpu.memory_space<semaphore_mem>>
      %165 = tpu.memref_squeeze %164 : memref<1x1x!tpu.dma_semaphore, #tpu.memory_space<semaphore_mem>> -> memref<!tpu.dma_semaphore, #tpu.memory_space<semaphore_mem>>
      tpu.enqueue_dma source(%161 : memref<1x128xf32, #tpu.memory_space<any>>) target(%163 : memref<1x128xf32, #tpu.memory_space<vmem>>) target_semaphore(%165 : memref<!tpu.dma_semaphore, #tpu.memory_space<semaphore_mem>>)
      %c16_i32_121 = arith.constant 16 : i32
      %166 = arith.muli %101, %c16_i32_121 : i32
      %c7_i32_122 = arith.constant 7 : i32
      %167 = arith.addi %166, %c7_i32_122 : i32
      %168 = arith.index_cast %167 : i32 to index
      %169 = memref.load %arg1[%168] : memref<16xi32, #tpu.memory_space<smem>>
      %c7_i32_123 = arith.constant 7 : i32
      %c0_i32_124 = arith.constant 0 : i32
      %170 = tpu.memref_slice %arg2[%169, %c0_i32_124] : memref<64x128xf32, #tpu.memory_space<any>> -> memref<1x128xf32, #tpu.memory_space<any>>
      %c7_i32_125 = arith.constant 7 : i32
      %c0_i32_126 = arith.constant 0 : i32
      %171 = tpu.memref_slice %arg4[%102, %c7_i32_125, %c0_i32_126] : memref<2x16x128xf32, #tpu.memory_space<vmem>> -> memref<1x1x128xf32, #tpu.memory_space<vmem>>
      %172 = tpu.memref_squeeze %171 : memref<1x1x128xf32, #tpu.memory_space<vmem>> -> memref<1x128xf32, #tpu.memory_space<vmem>>
      %173 = tpu.memref_slice %arg5[%102, %c7_i32_123] : memref<2x16x!tpu.dma_semaphore, #tpu.memory_space<semaphore_mem>> -> memref<1x1x!tpu.dma_semaphore, #tpu.memory_space<semaphore_mem>>
      %174 = tpu.memref_squeeze %173 : memref<1x1x!tpu.dma_semaphore, #tpu.memory_space<semaphore_mem>> -> memref<!tpu.dma_semaphore, #tpu.memory_space<semaphore_mem>>
      tpu.enqueue_dma source(%170 : memref<1x128xf32, #tpu.memory_space<any>>) target(%172 : memref<1x128xf32, #tpu.memory_space<vmem>>) target_semaphore(%174 : memref<!tpu.dma_semaphore, #tpu.memory_space<semaphore_mem>>)
      %c16_i32_127 = arith.constant 16 : i32
      %175 = arith.muli %101, %c16_i32_127 : i32
      %c8_i32_128 = arith.constant 8 : i32
      %176 = arith.addi %175, %c8_i32_128 : i32
      %177 = arith.index_cast %176 : i32 to index
      %178 = memref.load %arg1[%177] : memref<16xi32, #tpu.memory_space<smem>>
      %c8_i32_129 = arith.constant 8 : i32
      %c0_i32_130 = arith.constant 0 : i32
      %179 = tpu.memref_slice %arg2[%178, %c0_i32_130] : memref<64x128xf32, #tpu.memory_space<any>> -> memref<1x128xf32, #tpu.memory_space<any>>
      %c8_i32_131 = arith.constant 8 : i32
      %c0_i32_132 = arith.constant 0 : i32
      %180 = tpu.memref_slice %arg4[%102, %c8_i32_131, %c0_i32_132] : memref<2x16x128xf32, #tpu.memory_space<vmem>> -> memref<1x1x128xf32, #tpu.memory_space<vmem>>
      %181 = tpu.memref_squeeze %180 : memref<1x1x128xf32, #tpu.memory_space<vmem>> -> memref<1x128xf32, #tpu.memory_space<vmem>>
      %182 = tpu.memref_slice %arg5[%102, %c8_i32_129] : memref<2x16x!tpu.dma_semaphore, #tpu.memory_space<semaphore_mem>> -> memref<1x1x!tpu.dma_semaphore, #tpu.memory_space<semaphore_mem>>
      %183 = tpu.memref_squeeze %182 : memref<1x1x!tpu.dma_semaphore, #tpu.memory_space<semaphore_mem>> -> memref<!tpu.dma_semaphore, #tpu.memory_space<semaphore_mem>>
      tpu.enqueue_dma source(%179 : memref<1x128xf32, #tpu.memory_space<any>>) target(%181 : memref<1x128xf32, #tpu.memory_space<vmem>>) target_semaphore(%183 : memref<!tpu.dma_semaphore, #tpu.memory_space<semaphore_mem>>)
      %c16_i32_133 = arith.constant 16 : i32
      %184 = arith.muli %101, %c16_i32_133 : i32
      %c9_i32_134 = arith.constant 9 : i32
      %185 = arith.addi %184, %c9_i32_134 : i32
      %186 = arith.index_cast %185 : i32 to index
      %187 = memref.load %arg1[%186] : memref<16xi32, #tpu.memory_space<smem>>
      %c9_i32_135 = arith.constant 9 : i32
      %c0_i32_136 = arith.constant 0 : i32
      %188 = tpu.memref_slice %arg2[%187, %c0_i32_136] : memref<64x128xf32, #tpu.memory_space<any>> -> memref<1x128xf32, #tpu.memory_space<any>>
      %c9_i32_137 = arith.constant 9 : i32
      %c0_i32_138 = arith.constant 0 : i32
      %189 = tpu.memref_slice %arg4[%102, %c9_i32_137, %c0_i32_138] : memref<2x16x128xf32, #tpu.memory_space<vmem>> -> memref<1x1x128xf32, #tpu.memory_space<vmem>>
      %190 = tpu.memref_squeeze %189 : memref<1x1x128xf32, #tpu.memory_space<vmem>> -> memref<1x128xf32, #tpu.memory_space<vmem>>
      %191 = tpu.memref_slice %arg5[%102, %c9_i32_135] : memref<2x16x!tpu.dma_semaphore, #tpu.memory_space<semaphore_mem>> -> memref<1x1x!tpu.dma_semaphore, #tpu.memory_space<semaphore_mem>>
      %192 = tpu.memref_squeeze %191 : memref<1x1x!tpu.dma_semaphore, #tpu.memory_space<semaphore_mem>> -> memref<!tpu.dma_semaphore, #tpu.memory_space<semaphore_mem>>
      tpu.enqueue_dma source(%188 : memref<1x128xf32, #tpu.memory_space<any>>) target(%190 : memref<1x128xf32, #tpu.memory_space<vmem>>) target_semaphore(%192 : memref<!tpu.dma_semaphore, #tpu.memory_space<semaphore_mem>>)
      %c16_i32_139 = arith.constant 16 : i32
      %193 = arith.muli %101, %c16_i32_139 : i32
      %c10_i32_140 = arith.constant 10 : i32
      %194 = arith.addi %193, %c10_i32_140 : i32
      %195 = arith.index_cast %194 : i32 to index
      %196 = memref.load %arg1[%195] : memref<16xi32, #tpu.memory_space<smem>>
      %c10_i32_141 = arith.constant 10 : i32
      %c0_i32_142 = arith.constant 0 : i32
      %197 = tpu.memref_slice %arg2[%196, %c0_i32_142] : memref<64x128xf32, #tpu.memory_space<any>> -> memref<1x128xf32, #tpu.memory_space<any>>
      %c10_i32_143 = arith.constant 10 : i32
      %c0_i32_144 = arith.constant 0 : i32
      %198 = tpu.memref_slice %arg4[%102, %c10_i32_143, %c0_i32_144] : memref<2x16x128xf32, #tpu.memory_space<vmem>> -> memref<1x1x128xf32, #tpu.memory_space<vmem>>
      %199 = tpu.memref_squeeze %198 : memref<1x1x128xf32, #tpu.memory_space<vmem>> -> memref<1x128xf32, #tpu.memory_space<vmem>>
      %200 = tpu.memref_slice %arg5[%102, %c10_i32_141] : memref<2x16x!tpu.dma_semaphore, #tpu.memory_space<semaphore_mem>> -> memref<1x1x!tpu.dma_semaphore, #tpu.memory_space<semaphore_mem>>
      %201 = tpu.memref_squeeze %200 : memref<1x1x!tpu.dma_semaphore, #tpu.memory_space<semaphore_mem>> -> memref<!tpu.dma_semaphore, #tpu.memory_space<semaphore_mem>>
      tpu.enqueue_dma source(%197 : memref<1x128xf32, #tpu.memory_space<any>>) target(%199 : memref<1x128xf32, #tpu.memory_space<vmem>>) target_semaphore(%201 : memref<!tpu.dma_semaphore, #tpu.memory_space<semaphore_mem>>)
      %c16_i32_145 = arith.constant 16 : i32
      %202 = arith.muli %101, %c16_i32_145 : i32
      %c11_i32_146 = arith.constant 11 : i32
      %203 = arith.addi %202, %c11_i32_146 : i32
      %204 = arith.index_cast %203 : i32 to index
      %205 = memref.load %arg1[%204] : memref<16xi32, #tpu.memory_space<smem>>
      %c11_i32_147 = arith.constant 11 : i32
      %c0_i32_148 = arith.constant 0 : i32
      %206 = tpu.memref_slice %arg2[%205, %c0_i32_148] : memref<64x128xf32, #tpu.memory_space<any>> -> memref<1x128xf32, #tpu.memory_space<any>>
      %c11_i32_149 = arith.constant 11 : i32
      %c0_i32_150 = arith.constant 0 : i32
      %207 = tpu.memref_slice %arg4[%102, %c11_i32_149, %c0_i32_150] : memref<2x16x128xf32, #tpu.memory_space<vmem>> -> memref<1x1x128xf32, #tpu.memory_space<vmem>>
      %208 = tpu.memref_squeeze %207 : memref<1x1x128xf32, #tpu.memory_space<vmem>> -> memref<1x128xf32, #tpu.memory_space<vmem>>
      %209 = tpu.memref_slice %arg5[%102, %c11_i32_147] : memref<2x16x!tpu.dma_semaphore, #tpu.memory_space<semaphore_mem>> -> memref<1x1x!tpu.dma_semaphore, #tpu.memory_space<semaphore_mem>>
      %210 = tpu.memref_squeeze %209 : memref<1x1x!tpu.dma_semaphore, #tpu.memory_space<semaphore_mem>> -> memref<!tpu.dma_semaphore, #tpu.memory_space<semaphore_mem>>
      tpu.enqueue_dma source(%206 : memref<1x128xf32, #tpu.memory_space<any>>) target(%208 : memref<1x128xf32, #tpu.memory_space<vmem>>) target_semaphore(%210 : memref<!tpu.dma_semaphore, #tpu.memory_space<semaphore_mem>>)
      %c16_i32_151 = arith.constant 16 : i32
      %211 = arith.muli %101, %c16_i32_151 : i32
      %c12_i32_152 = arith.constant 12 : i32
      %212 = arith.addi %211, %c12_i32_152 : i32
      %213 = arith.index_cast %212 : i32 to index
      %214 = memref.load %arg1[%213] : memref<16xi32, #tpu.memory_space<smem>>
      %c12_i32_153 = arith.constant 12 : i32
      %c0_i32_154 = arith.constant 0 : i32
      %215 = tpu.memref_slice %arg2[%214, %c0_i32_154] : memref<64x128xf32, #tpu.memory_space<any>> -> memref<1x128xf32, #tpu.memory_space<any>>
      %c12_i32_155 = arith.constant 12 : i32
      %c0_i32_156 = arith.constant 0 : i32
      %216 = tpu.memref_slice %arg4[%102, %c12_i32_155, %c0_i32_156] : memref<2x16x128xf32, #tpu.memory_space<vmem>> -> memref<1x1x128xf32, #tpu.memory_space<vmem>>
      %217 = tpu.memref_squeeze %216 : memref<1x1x128xf32, #tpu.memory_space<vmem>> -> memref<1x128xf32, #tpu.memory_space<vmem>>
      %218 = tpu.memref_slice %arg5[%102, %c12_i32_153] : memref<2x16x!tpu.dma_semaphore, #tpu.memory_space<semaphore_mem>> -> memref<1x1x!tpu.dma_semaphore, #tpu.memory_space<semaphore_mem>>
      %219 = tpu.memref_squeeze %218 : memref<1x1x!tpu.dma_semaphore, #tpu.memory_space<semaphore_mem>> -> memref<!tpu.dma_semaphore, #tpu.memory_space<semaphore_mem>>
      tpu.enqueue_dma source(%215 : memref<1x128xf32, #tpu.memory_space<any>>) target(%217 : memref<1x128xf32, #tpu.memory_space<vmem>>) target_semaphore(%219 : memref<!tpu.dma_semaphore, #tpu.memory_space<semaphore_mem>>)
      %c16_i32_157 = arith.constant 16 : i32
      %220 = arith.muli %101, %c16_i32_157 : i32
      %c13_i32_158 = arith.constant 13 : i32
      %221 = arith.addi %220, %c13_i32_158 : i32
      %222 = arith.index_cast %221 : i32 to index
      %223 = memref.load %arg1[%222] : memref<16xi32, #tpu.memory_space<smem>>
      %c13_i32_159 = arith.constant 13 : i32
      %c0_i32_160 = arith.constant 0 : i32
      %224 = tpu.memref_slice %arg2[%223, %c0_i32_160] : memref<64x128xf32, #tpu.memory_space<any>> -> memref<1x128xf32, #tpu.memory_space<any>>
      %c13_i32_161 = arith.constant 13 : i32
      %c0_i32_162 = arith.constant 0 : i32
      %225 = tpu.memref_slice %arg4[%102, %c13_i32_161, %c0_i32_162] : memref<2x16x128xf32, #tpu.memory_space<vmem>> -> memref<1x1x128xf32, #tpu.memory_space<vmem>>
      %226 = tpu.memref_squeeze %225 : memref<1x1x128xf32, #tpu.memory_space<vmem>> -> memref<1x128xf32, #tpu.memory_space<vmem>>
      %227 = tpu.memref_slice %arg5[%102, %c13_i32_159] : memref<2x16x!tpu.dma_semaphore, #tpu.memory_space<semaphore_mem>> -> memref<1x1x!tpu.dma_semaphore, #tpu.memory_space<semaphore_mem>>
      %228 = tpu.memref_squeeze %227 : memref<1x1x!tpu.dma_semaphore, #tpu.memory_space<semaphore_mem>> -> memref<!tpu.dma_semaphore, #tpu.memory_space<semaphore_mem>>
      tpu.enqueue_dma source(%224 : memref<1x128xf32, #tpu.memory_space<any>>) target(%226 : memref<1x128xf32, #tpu.memory_space<vmem>>) target_semaphore(%228 : memref<!tpu.dma_semaphore, #tpu.memory_space<semaphore_mem>>)
      %c16_i32_163 = arith.constant 16 : i32
      %229 = arith.muli %101, %c16_i32_163 : i32
      %c14_i32_164 = arith.constant 14 : i32
      %230 = arith.addi %229, %c14_i32_164 : i32
      %231 = arith.index_cast %230 : i32 to index
      %232 = memref.load %arg1[%231] : memref<16xi32, #tpu.memory_space<smem>>
      %c14_i32_165 = arith.constant 14 : i32
      %c0_i32_166 = arith.constant 0 : i32
      %233 = tpu.memref_slice %arg2[%232, %c0_i32_166] : memref<64x128xf32, #tpu.memory_space<any>> -> memref<1x128xf32, #tpu.memory_space<any>>
      %c14_i32_167 = arith.constant 14 : i32
      %c0_i32_168 = arith.constant 0 : i32
      %234 = tpu.memref_slice %arg4[%102, %c14_i32_167, %c0_i32_168] : memref<2x16x128xf32, #tpu.memory_space<vmem>> -> memref<1x1x128xf32, #tpu.memory_space<vmem>>
      %235 = tpu.memref_squeeze %234 : memref<1x1x128xf32, #tpu.memory_space<vmem>> -> memref<1x128xf32, #tpu.memory_space<vmem>>
      %236 = tpu.memref_slice %arg5[%102, %c14_i32_165] : memref<2x16x!tpu.dma_semaphore, #tpu.memory_space<semaphore_mem>> -> memref<1x1x!tpu.dma_semaphore, #tpu.memory_space<semaphore_mem>>
      %237 = tpu.memref_squeeze %236 : memref<1x1x!tpu.dma_semaphore, #tpu.memory_space<semaphore_mem>> -> memref<!tpu.dma_semaphore, #tpu.memory_space<semaphore_mem>>
      tpu.enqueue_dma source(%233 : memref<1x128xf32, #tpu.memory_space<any>>) target(%235 : memref<1x128xf32, #tpu.memory_space<vmem>>) target_semaphore(%237 : memref<!tpu.dma_semaphore, #tpu.memory_space<semaphore_mem>>)
      %c16_i32_169 = arith.constant 16 : i32
      %238 = arith.muli %101, %c16_i32_169 : i32
      %c15_i32_170 = arith.constant 15 : i32
      %239 = arith.addi %238, %c15_i32_170 : i32
      %240 = arith.index_cast %239 : i32 to index
      %241 = memref.load %arg1[%240] : memref<16xi32, #tpu.memory_space<smem>>
      %c15_i32_171 = arith.constant 15 : i32
      %c0_i32_172 = arith.constant 0 : i32
      %242 = tpu.memref_slice %arg2[%241, %c0_i32_172] : memref<64x128xf32, #tpu.memory_space<any>> -> memref<1x128xf32, #tpu.memory_space<any>>
      %c15_i32_173 = arith.constant 15 : i32
      %c0_i32_174 = arith.constant 0 : i32
      %243 = tpu.memref_slice %arg4[%102, %c15_i32_173, %c0_i32_174] : memref<2x16x128xf32, #tpu.memory_space<vmem>> -> memref<1x1x128xf32, #tpu.memory_space<vmem>>
      %244 = tpu.memref_squeeze %243 : memref<1x1x128xf32, #tpu.memory_space<vmem>> -> memref<1x128xf32, #tpu.memory_space<vmem>>
      %245 = tpu.memref_slice %arg5[%102, %c15_i32_171] : memref<2x16x!tpu.dma_semaphore, #tpu.memory_space<semaphore_mem>> -> memref<1x1x!tpu.dma_semaphore, #tpu.memory_space<semaphore_mem>>
      %246 = tpu.memref_squeeze %245 : memref<1x1x!tpu.dma_semaphore, #tpu.memory_space<semaphore_mem>> -> memref<!tpu.dma_semaphore, #tpu.memory_space<semaphore_mem>>
      tpu.enqueue_dma source(%242 : memref<1x128xf32, #tpu.memory_space<any>>) target(%244 : memref<1x128xf32, #tpu.memory_space<vmem>>) target_semaphore(%246 : memref<!tpu.dma_semaphore, #tpu.memory_space<semaphore_mem>>)
    } else {
    }
    %c0_i32_8 = arith.constant 0 : i32
    %c0_i32_9 = arith.constant 0 : i32
    %c0_i32_10 = arith.constant 0 : i32
    %17 = tpu.memref_slice %arg2[%c0_i32_9, %c0_i32_10] : memref<64x128xf32, #tpu.memory_space<any>> -> memref<1x128xf32, #tpu.memory_space<any>>
    %c0_i32_11 = arith.constant 0 : i32
    %c0_i32_12 = arith.constant 0 : i32
    %18 = tpu.memref_slice %arg4[%9, %c0_i32_11, %c0_i32_12] : memref<2x16x128xf32, #tpu.memory_space<vmem>> -> memref<1x1x128xf32, #tpu.memory_space<vmem>>
    %19 = tpu.memref_squeeze %18 : memref<1x1x128xf32, #tpu.memory_space<vmem>> -> memref<1x128xf32, #tpu.memory_space<vmem>>
    %20 = tpu.memref_slice %arg5[%9, %c0_i32_8] : memref<2x16x!tpu.dma_semaphore, #tpu.memory_space<semaphore_mem>> -> memref<1x1x!tpu.dma_semaphore, #tpu.memory_space<semaphore_mem>>
    %21 = tpu.memref_squeeze %20 : memref<1x1x!tpu.dma_semaphore, #tpu.memory_space<semaphore_mem>> -> memref<!tpu.dma_semaphore, #tpu.memory_space<semaphore_mem>>
    tpu.wait_dma2 semaphore(%21 : memref<!tpu.dma_semaphore, #tpu.memory_space<semaphore_mem>>) src(%17 : memref<1x128xf32, #tpu.memory_space<any>>) dst(%19 : memref<1x128xf32, #tpu.memory_space<vmem>>)
    %c1_i32_13 = arith.constant 1 : i32
    %c0_i32_14 = arith.constant 0 : i32
    %c0_i32_15 = arith.constant 0 : i32
    %22 = tpu.memref_slice %arg2[%c0_i32_14, %c0_i32_15] : memref<64x128xf32, #tpu.memory_space<any>> -> memref<1x128xf32, #tpu.memory_space<any>>
    %c1_i32_16 = arith.constant 1 : i32
    %c0_i32_17 = arith.constant 0 : i32
    %23 = tpu.memref_slice %arg4[%9, %c1_i32_16, %c0_i32_17] : memref<2x16x128xf32, #tpu.memory_space<vmem>> -> memref<1x1x128xf32, #tpu.memory_space<vmem>>
    %24 = tpu.memref_squeeze %23 : memref<1x1x128xf32, #tpu.memory_space<vmem>> -> memref<1x128xf32, #tpu.memory_space<vmem>>
    %25 = tpu.memref_slice %arg5[%9, %c1_i32_13] : memref<2x16x!tpu.dma_semaphore, #tpu.memory_space<semaphore_mem>> -> memref<1x1x!tpu.dma_semaphore, #tpu.memory_space<semaphore_mem>>
    %26 = tpu.memref_squeeze %25 : memref<1x1x!tpu.dma_semaphore, #tpu.memory_space<semaphore_mem>> -> memref<!tpu.dma_semaphore, #tpu.memory_space<semaphore_mem>>
    tpu.wait_dma2 semaphore(%26 : memref<!tpu.dma_semaphore, #tpu.memory_space<semaphore_mem>>) src(%22 : memref<1x128xf32, #tpu.memory_space<any>>) dst(%24 : memref<1x128xf32, #tpu.memory_space<vmem>>)
    %c2_i32_18 = arith.constant 2 : i32
    %c0_i32_19 = arith.constant 0 : i32
    %c0_i32_20 = arith.constant 0 : i32
    %27 = tpu.memref_slice %arg2[%c0_i32_19, %c0_i32_20] : memref<64x128xf32, #tpu.memory_space<any>> -> memref<1x128xf32, #tpu.memory_space<any>>
    %c2_i32_21 = arith.constant 2 : i32
    %c0_i32_22 = arith.constant 0 : i32
    %28 = tpu.memref_slice %arg4[%9, %c2_i32_21, %c0_i32_22] : memref<2x16x128xf32, #tpu.memory_space<vmem>> -> memref<1x1x128xf32, #tpu.memory_space<vmem>>
    %29 = tpu.memref_squeeze %28 : memref<1x1x128xf32, #tpu.memory_space<vmem>> -> memref<1x128xf32, #tpu.memory_space<vmem>>
    %30 = tpu.memref_slice %arg5[%9, %c2_i32_18] : memref<2x16x!tpu.dma_semaphore, #tpu.memory_space<semaphore_mem>> -> memref<1x1x!tpu.dma_semaphore, #tpu.memory_space<semaphore_mem>>
    %31 = tpu.memref_squeeze %30 : memref<1x1x!tpu.dma_semaphore, #tpu.memory_space<semaphore_mem>> -> memref<!tpu.dma_semaphore, #tpu.memory_space<semaphore_mem>>
    tpu.wait_dma2 semaphore(%31 : memref<!tpu.dma_semaphore, #tpu.memory_space<semaphore_mem>>) src(%27 : memref<1x128xf32, #tpu.memory_space<any>>) dst(%29 : memref<1x128xf32, #tpu.memory_space<vmem>>)
    %c3_i32 = arith.constant 3 : i32
    %c0_i32_23 = arith.constant 0 : i32
    %c0_i32_24 = arith.constant 0 : i32
    %32 = tpu.memref_slice %arg2[%c0_i32_23, %c0_i32_24] : memref<64x128xf32, #tpu.memory_space<any>> -> memref<1x128xf32, #tpu.memory_space<any>>
    %c3_i32_25 = arith.constant 3 : i32
    %c0_i32_26 = arith.constant 0 : i32
    %33 = tpu.memref_slice %arg4[%9, %c3_i32_25, %c0_i32_26] : memref<2x16x128xf32, #tpu.memory_space<vmem>> -> memref<1x1x128xf32, #tpu.memory_space<vmem>>
    %34 = tpu.memref_squeeze %33 : memref<1x1x128xf32, #tpu.memory_space<vmem>> -> memref<1x128xf32, #tpu.memory_space<vmem>>
    %35 = tpu.memref_slice %arg5[%9, %c3_i32] : memref<2x16x!tpu.dma_semaphore, #tpu.memory_space<semaphore_mem>> -> memref<1x1x!tpu.dma_semaphore, #tpu.memory_space<semaphore_mem>>
    %36 = tpu.memref_squeeze %35 : memref<1x1x!tpu.dma_semaphore, #tpu.memory_space<semaphore_mem>> -> memref<!tpu.dma_semaphore, #tpu.memory_space<semaphore_mem>>
    tpu.wait_dma2 semaphore(%36 : memref<!tpu.dma_semaphore, #tpu.memory_space<semaphore_mem>>) src(%32 : memref<1x128xf32, #tpu.memory_space<any>>) dst(%34 : memref<1x128xf32, #tpu.memory_space<vmem>>)
    %c4_i32 = arith.constant 4 : i32
    %c0_i32_27 = arith.constant 0 : i32
    %c0_i32_28 = arith.constant 0 : i32
    %37 = tpu.memref_slice %arg2[%c0_i32_27, %c0_i32_28] : memref<64x128xf32, #tpu.memory_space<any>> -> memref<1x128xf32, #tpu.memory_space<any>>
    %c4_i32_29 = arith.constant 4 : i32
    %c0_i32_30 = arith.constant 0 : i32
    %38 = tpu.memref_slice %arg4[%9, %c4_i32_29, %c0_i32_30] : memref<2x16x128xf32, #tpu.memory_space<vmem>> -> memref<1x1x128xf32, #tpu.memory_space<vmem>>
    %39 = tpu.memref_squeeze %38 : memref<1x1x128xf32, #tpu.memory_space<vmem>> -> memref<1x128xf32, #tpu.memory_space<vmem>>
    %40 = tpu.memref_slice %arg5[%9, %c4_i32] : memref<2x16x!tpu.dma_semaphore, #tpu.memory_space<semaphore_mem>> -> memref<1x1x!tpu.dma_semaphore, #tpu.memory_space<semaphore_mem>>
    %41 = tpu.memref_squeeze %40 : memref<1x1x!tpu.dma_semaphore, #tpu.memory_space<semaphore_mem>> -> memref<!tpu.dma_semaphore, #tpu.memory_space<semaphore_mem>>
    tpu.wait_dma2 semaphore(%41 : memref<!tpu.dma_semaphore, #tpu.memory_space<semaphore_mem>>) src(%37 : memref<1x128xf32, #tpu.memory_space<any>>) dst(%39 : memref<1x128xf32, #tpu.memory_space<vmem>>)
    %c5_i32 = arith.constant 5 : i32
    %c0_i32_31 = arith.constant 0 : i32
    %c0_i32_32 = arith.constant 0 : i32
    %42 = tpu.memref_slice %arg2[%c0_i32_31, %c0_i32_32] : memref<64x128xf32, #tpu.memory_space<any>> -> memref<1x128xf32, #tpu.memory_space<any>>
    %c5_i32_33 = arith.constant 5 : i32
    %c0_i32_34 = arith.constant 0 : i32
    %43 = tpu.memref_slice %arg4[%9, %c5_i32_33, %c0_i32_34] : memref<2x16x128xf32, #tpu.memory_space<vmem>> -> memref<1x1x128xf32, #tpu.memory_space<vmem>>
    %44 = tpu.memref_squeeze %43 : memref<1x1x128xf32, #tpu.memory_space<vmem>> -> memref<1x128xf32, #tpu.memory_space<vmem>>
    %45 = tpu.memref_slice %arg5[%9, %c5_i32] : memref<2x16x!tpu.dma_semaphore, #tpu.memory_space<semaphore_mem>> -> memref<1x1x!tpu.dma_semaphore, #tpu.memory_space<semaphore_mem>>
    %46 = tpu.memref_squeeze %45 : memref<1x1x!tpu.dma_semaphore, #tpu.memory_space<semaphore_mem>> -> memref<!tpu.dma_semaphore, #tpu.memory_space<semaphore_mem>>
    tpu.wait_dma2 semaphore(%46 : memref<!tpu.dma_semaphore, #tpu.memory_space<semaphore_mem>>) src(%42 : memref<1x128xf32, #tpu.memory_space<any>>) dst(%44 : memref<1x128xf32, #tpu.memory_space<vmem>>)
    %c6_i32 = arith.constant 6 : i32
    %c0_i32_35 = arith.constant 0 : i32
    %c0_i32_36 = arith.constant 0 : i32
    %47 = tpu.memref_slice %arg2[%c0_i32_35, %c0_i32_36] : memref<64x128xf32, #tpu.memory_space<any>> -> memref<1x128xf32, #tpu.memory_space<any>>
    %c6_i32_37 = arith.constant 6 : i32
    %c0_i32_38 = arith.constant 0 : i32
    %48 = tpu.memref_slice %arg4[%9, %c6_i32_37, %c0_i32_38] : memref<2x16x128xf32, #tpu.memory_space<vmem>> -> memref<1x1x128xf32, #tpu.memory_space<vmem>>
    %49 = tpu.memref_squeeze %48 : memref<1x1x128xf32, #tpu.memory_space<vmem>> -> memref<1x128xf32, #tpu.memory_space<vmem>>
    %50 = tpu.memref_slice %arg5[%9, %c6_i32] : memref<2x16x!tpu.dma_semaphore, #tpu.memory_space<semaphore_mem>> -> memref<1x1x!tpu.dma_semaphore, #tpu.memory_space<semaphore_mem>>
    %51 = tpu.memref_squeeze %50 : memref<1x1x!tpu.dma_semaphore, #tpu.memory_space<semaphore_mem>> -> memref<!tpu.dma_semaphore, #tpu.memory_space<semaphore_mem>>
    tpu.wait_dma2 semaphore(%51 : memref<!tpu.dma_semaphore, #tpu.memory_space<semaphore_mem>>) src(%47 : memref<1x128xf32, #tpu.memory_space<any>>) dst(%49 : memref<1x128xf32, #tpu.memory_space<vmem>>)
    %c7_i32 = arith.constant 7 : i32
    %c0_i32_39 = arith.constant 0 : i32
    %c0_i32_40 = arith.constant 0 : i32
    %52 = tpu.memref_slice %arg2[%c0_i32_39, %c0_i32_40] : memref<64x128xf32, #tpu.memory_space<any>> -> memref<1x128xf32, #tpu.memory_space<any>>
    %c7_i32_41 = arith.constant 7 : i32
    %c0_i32_42 = arith.constant 0 : i32
    %53 = tpu.memref_slice %arg4[%9, %c7_i32_41, %c0_i32_42] : memref<2x16x128xf32, #tpu.memory_space<vmem>> -> memref<1x1x128xf32, #tpu.memory_space<vmem>>
    %54 = tpu.memref_squeeze %53 : memref<1x1x128xf32, #tpu.memory_space<vmem>> -> memref<1x128xf32, #tpu.memory_space<vmem>>
    %55 = tpu.memref_slice %arg5[%9, %c7_i32] : memref<2x16x!tpu.dma_semaphore, #tpu.memory_space<semaphore_mem>> -> memref<1x1x!tpu.dma_semaphore, #tpu.memory_space<semaphore_mem>>
    %56 = tpu.memref_squeeze %55 : memref<1x1x!tpu.dma_semaphore, #tpu.memory_space<semaphore_mem>> -> memref<!tpu.dma_semaphore, #tpu.memory_space<semaphore_mem>>
    tpu.wait_dma2 semaphore(%56 : memref<!tpu.dma_semaphore, #tpu.memory_space<semaphore_mem>>) src(%52 : memref<1x128xf32, #tpu.memory_space<any>>) dst(%54 : memref<1x128xf32, #tpu.memory_space<vmem>>)
    %c8_i32 = arith.constant 8 : i32
    %c0_i32_43 = arith.constant 0 : i32
    %c0_i32_44 = arith.constant 0 : i32
    %57 = tpu.memref_slice %arg2[%c0_i32_43, %c0_i32_44] : memref<64x128xf32, #tpu.memory_space<any>> -> memref<1x128xf32, #tpu.memory_space<any>>
    %c8_i32_45 = arith.constant 8 : i32
    %c0_i32_46 = arith.constant 0 : i32
    %58 = tpu.memref_slice %arg4[%9, %c8_i32_45, %c0_i32_46] : memref<2x16x128xf32, #tpu.memory_space<vmem>> -> memref<1x1x128xf32, #tpu.memory_space<vmem>>
    %59 = tpu.memref_squeeze %58 : memref<1x1x128xf32, #tpu.memory_space<vmem>> -> memref<1x128xf32, #tpu.memory_space<vmem>>
    %60 = tpu.memref_slice %arg5[%9, %c8_i32] : memref<2x16x!tpu.dma_semaphore, #tpu.memory_space<semaphore_mem>> -> memref<1x1x!tpu.dma_semaphore, #tpu.memory_space<semaphore_mem>>
    %61 = tpu.memref_squeeze %60 : memref<1x1x!tpu.dma_semaphore, #tpu.memory_space<semaphore_mem>> -> memref<!tpu.dma_semaphore, #tpu.memory_space<semaphore_mem>>
    tpu.wait_dma2 semaphore(%61 : memref<!tpu.dma_semaphore, #tpu.memory_space<semaphore_mem>>) src(%57 : memref<1x128xf32, #tpu.memory_space<any>>) dst(%59 : memref<1x128xf32, #tpu.memory_space<vmem>>)
    %c9_i32 = arith.constant 9 : i32
    %c0_i32_47 = arith.constant 0 : i32
    %c0_i32_48 = arith.constant 0 : i32
    %62 = tpu.memref_slice %arg2[%c0_i32_47, %c0_i32_48] : memref<64x128xf32, #tpu.memory_space<any>> -> memref<1x128xf32, #tpu.memory_space<any>>
    %c9_i32_49 = arith.constant 9 : i32
    %c0_i32_50 = arith.constant 0 : i32
    %63 = tpu.memref_slice %arg4[%9, %c9_i32_49, %c0_i32_50] : memref<2x16x128xf32, #tpu.memory_space<vmem>> -> memref<1x1x128xf32, #tpu.memory_space<vmem>>
    %64 = tpu.memref_squeeze %63 : memref<1x1x128xf32, #tpu.memory_space<vmem>> -> memref<1x128xf32, #tpu.memory_space<vmem>>
    %65 = tpu.memref_slice %arg5[%9, %c9_i32] : memref<2x16x!tpu.dma_semaphore, #tpu.memory_space<semaphore_mem>> -> memref<1x1x!tpu.dma_semaphore, #tpu.memory_space<semaphore_mem>>
    %66 = tpu.memref_squeeze %65 : memref<1x1x!tpu.dma_semaphore, #tpu.memory_space<semaphore_mem>> -> memref<!tpu.dma_semaphore, #tpu.memory_space<semaphore_mem>>
    tpu.wait_dma2 semaphore(%66 : memref<!tpu.dma_semaphore, #tpu.memory_space<semaphore_mem>>) src(%62 : memref<1x128xf32, #tpu.memory_space<any>>) dst(%64 : memref<1x128xf32, #tpu.memory_space<vmem>>)
    %c10_i32 = arith.constant 10 : i32
    %c0_i32_51 = arith.constant 0 : i32
    %c0_i32_52 = arith.constant 0 : i32
    %67 = tpu.memref_slice %arg2[%c0_i32_51, %c0_i32_52] : memref<64x128xf32, #tpu.memory_space<any>> -> memref<1x128xf32, #tpu.memory_space<any>>
    %c10_i32_53 = arith.constant 10 : i32
    %c0_i32_54 = arith.constant 0 : i32
    %68 = tpu.memref_slice %arg4[%9, %c10_i32_53, %c0_i32_54] : memref<2x16x128xf32, #tpu.memory_space<vmem>> -> memref<1x1x128xf32, #tpu.memory_space<vmem>>
    %69 = tpu.memref_squeeze %68 : memref<1x1x128xf32, #tpu.memory_space<vmem>> -> memref<1x128xf32, #tpu.memory_space<vmem>>
    %70 = tpu.memref_slice %arg5[%9, %c10_i32] : memref<2x16x!tpu.dma_semaphore, #tpu.memory_space<semaphore_mem>> -> memref<1x1x!tpu.dma_semaphore, #tpu.memory_space<semaphore_mem>>
    %71 = tpu.memref_squeeze %70 : memref<1x1x!tpu.dma_semaphore, #tpu.memory_space<semaphore_mem>> -> memref<!tpu.dma_semaphore, #tpu.memory_space<semaphore_mem>>
    tpu.wait_dma2 semaphore(%71 : memref<!tpu.dma_semaphore, #tpu.memory_space<semaphore_mem>>) src(%67 : memref<1x128xf32, #tpu.memory_space<any>>) dst(%69 : memref<1x128xf32, #tpu.memory_space<vmem>>)
    %c11_i32 = arith.constant 11 : i32
    %c0_i32_55 = arith.constant 0 : i32
    %c0_i32_56 = arith.constant 0 : i32
    %72 = tpu.memref_slice %arg2[%c0_i32_55, %c0_i32_56] : memref<64x128xf32, #tpu.memory_space<any>> -> memref<1x128xf32, #tpu.memory_space<any>>
    %c11_i32_57 = arith.constant 11 : i32
    %c0_i32_58 = arith.constant 0 : i32
    %73 = tpu.memref_slice %arg4[%9, %c11_i32_57, %c0_i32_58] : memref<2x16x128xf32, #tpu.memory_space<vmem>> -> memref<1x1x128xf32, #tpu.memory_space<vmem>>
    %74 = tpu.memref_squeeze %73 : memref<1x1x128xf32, #tpu.memory_space<vmem>> -> memref<1x128xf32, #tpu.memory_space<vmem>>
    %75 = tpu.memref_slice %arg5[%9, %c11_i32] : memref<2x16x!tpu.dma_semaphore, #tpu.memory_space<semaphore_mem>> -> memref<1x1x!tpu.dma_semaphore, #tpu.memory_space<semaphore_mem>>
    %76 = tpu.memref_squeeze %75 : memref<1x1x!tpu.dma_semaphore, #tpu.memory_space<semaphore_mem>> -> memref<!tpu.dma_semaphore, #tpu.memory_space<semaphore_mem>>
    tpu.wait_dma2 semaphore(%76 : memref<!tpu.dma_semaphore, #tpu.memory_space<semaphore_mem>>) src(%72 : memref<1x128xf32, #tpu.memory_space<any>>) dst(%74 : memref<1x128xf32, #tpu.memory_space<vmem>>)
    %c12_i32 = arith.constant 12 : i32
    %c0_i32_59 = arith.constant 0 : i32
    %c0_i32_60 = arith.constant 0 : i32
    %77 = tpu.memref_slice %arg2[%c0_i32_59, %c0_i32_60] : memref<64x128xf32, #tpu.memory_space<any>> -> memref<1x128xf32, #tpu.memory_space<any>>
    %c12_i32_61 = arith.constant 12 : i32
    %c0_i32_62 = arith.constant 0 : i32
    %78 = tpu.memref_slice %arg4[%9, %c12_i32_61, %c0_i32_62] : memref<2x16x128xf32, #tpu.memory_space<vmem>> -> memref<1x1x128xf32, #tpu.memory_space<vmem>>
    %79 = tpu.memref_squeeze %78 : memref<1x1x128xf32, #tpu.memory_space<vmem>> -> memref<1x128xf32, #tpu.memory_space<vmem>>
    %80 = tpu.memref_slice %arg5[%9, %c12_i32] : memref<2x16x!tpu.dma_semaphore, #tpu.memory_space<semaphore_mem>> -> memref<1x1x!tpu.dma_semaphore, #tpu.memory_space<semaphore_mem>>
    %81 = tpu.memref_squeeze %80 : memref<1x1x!tpu.dma_semaphore, #tpu.memory_space<semaphore_mem>> -> memref<!tpu.dma_semaphore, #tpu.memory_space<semaphore_mem>>
    tpu.wait_dma2 semaphore(%81 : memref<!tpu.dma_semaphore, #tpu.memory_space<semaphore_mem>>) src(%77 : memref<1x128xf32, #tpu.memory_space<any>>) dst(%79 : memref<1x128xf32, #tpu.memory_space<vmem>>)
    %c13_i32 = arith.constant 13 : i32
    %c0_i32_63 = arith.constant 0 : i32
    %c0_i32_64 = arith.constant 0 : i32
    %82 = tpu.memref_slice %arg2[%c0_i32_63, %c0_i32_64] : memref<64x128xf32, #tpu.memory_space<any>> -> memref<1x128xf32, #tpu.memory_space<any>>
    %c13_i32_65 = arith.constant 13 : i32
    %c0_i32_66 = arith.constant 0 : i32
    %83 = tpu.memref_slice %arg4[%9, %c13_i32_65, %c0_i32_66] : memref<2x16x128xf32, #tpu.memory_space<vmem>> -> memref<1x1x128xf32, #tpu.memory_space<vmem>>
    %84 = tpu.memref_squeeze %83 : memref<1x1x128xf32, #tpu.memory_space<vmem>> -> memref<1x128xf32, #tpu.memory_space<vmem>>
    %85 = tpu.memref_slice %arg5[%9, %c13_i32] : memref<2x16x!tpu.dma_semaphore, #tpu.memory_space<semaphore_mem>> -> memref<1x1x!tpu.dma_semaphore, #tpu.memory_space<semaphore_mem>>
    %86 = tpu.memref_squeeze %85 : memref<1x1x!tpu.dma_semaphore, #tpu.memory_space<semaphore_mem>> -> memref<!tpu.dma_semaphore, #tpu.memory_space<semaphore_mem>>
    tpu.wait_dma2 semaphore(%86 : memref<!tpu.dma_semaphore, #tpu.memory_space<semaphore_mem>>) src(%82 : memref<1x128xf32, #tpu.memory_space<any>>) dst(%84 : memref<1x128xf32, #tpu.memory_space<vmem>>)
    %c14_i32 = arith.constant 14 : i32
    %c0_i32_67 = arith.constant 0 : i32
    %c0_i32_68 = arith.constant 0 : i32
    %87 = tpu.memref_slice %arg2[%c0_i32_67, %c0_i32_68] : memref<64x128xf32, #tpu.memory_space<any>> -> memref<1x128xf32, #tpu.memory_space<any>>
    %c14_i32_69 = arith.constant 14 : i32
    %c0_i32_70 = arith.constant 0 : i32
    %88 = tpu.memref_slice %arg4[%9, %c14_i32_69, %c0_i32_70] : memref<2x16x128xf32, #tpu.memory_space<vmem>> -> memref<1x1x128xf32, #tpu.memory_space<vmem>>
    %89 = tpu.memref_squeeze %88 : memref<1x1x128xf32, #tpu.memory_space<vmem>> -> memref<1x128xf32, #tpu.memory_space<vmem>>
    %90 = tpu.memref_slice %arg5[%9, %c14_i32] : memref<2x16x!tpu.dma_semaphore, #tpu.memory_space<semaphore_mem>> -> memref<1x1x!tpu.dma_semaphore, #tpu.memory_space<semaphore_mem>>
    %91 = tpu.memref_squeeze %90 : memref<1x1x!tpu.dma_semaphore, #tpu.memory_space<semaphore_mem>> -> memref<!tpu.dma_semaphore, #tpu.memory_space<semaphore_mem>>
    tpu.wait_dma2 semaphore(%91 : memref<!tpu.dma_semaphore, #tpu.memory_space<semaphore_mem>>) src(%87 : memref<1x128xf32, #tpu.memory_space<any>>) dst(%89 : memref<1x128xf32, #tpu.memory_space<vmem>>)
    %c15_i32 = arith.constant 15 : i32
    %c0_i32_71 = arith.constant 0 : i32
    %c0_i32_72 = arith.constant 0 : i32
    %92 = tpu.memref_slice %arg2[%c0_i32_71, %c0_i32_72] : memref<64x128xf32, #tpu.memory_space<any>> -> memref<1x128xf32, #tpu.memory_space<any>>
    %c15_i32_73 = arith.constant 15 : i32
    %c0_i32_74 = arith.constant 0 : i32
    %93 = tpu.memref_slice %arg4[%9, %c15_i32_73, %c0_i32_74] : memref<2x16x128xf32, #tpu.memory_space<vmem>> -> memref<1x1x128xf32, #tpu.memory_space<vmem>>
    %94 = tpu.memref_squeeze %93 : memref<1x1x128xf32, #tpu.memory_space<vmem>> -> memref<1x128xf32, #tpu.memory_space<vmem>>
    %95 = tpu.memref_slice %arg5[%9, %c15_i32] : memref<2x16x!tpu.dma_semaphore, #tpu.memory_space<semaphore_mem>> -> memref<1x1x!tpu.dma_semaphore, #tpu.memory_space<semaphore_mem>>
    %96 = tpu.memref_squeeze %95 : memref<1x1x!tpu.dma_semaphore, #tpu.memory_space<semaphore_mem>> -> memref<!tpu.dma_semaphore, #tpu.memory_space<semaphore_mem>>
    tpu.wait_dma2 semaphore(%96 : memref<!tpu.dma_semaphore, #tpu.memory_space<semaphore_mem>>) src(%92 : memref<1x128xf32, #tpu.memory_space<any>>) dst(%94 : memref<1x128xf32, #tpu.memory_space<vmem>>)
    %97 = arith.index_cast %9 : i32 to index
    %c0 = arith.constant 0 : index
    %c0_75 = arith.constant 0 : index
    %98 = vector.load %arg4[%97, %c0, %c0_75] : memref<2x16x128xf32, #tpu.memory_space<vmem>>, vector<1x16x128xf32>
    %99 = vector.shape_cast %98 : vector<1x16x128xf32> to vector<16x128xf32>
    %c0_76 = arith.constant 0 : index
    %c0_77 = arith.constant 0 : index
    %100 = vector.load %arg3[%c0_76, %c0_77] : memref<16x128xf32, #tpu.memory_space<vmem>>, vector<16x128xf32>
    tpu.vector_store %arg3[%c0_76, %c0_77], %99 {strides = array<i32>} : memref<16x128xf32, #tpu.memory_space<vmem>>, vector<16x128xf32>,
    return
  }
  func.func @transform_1(%arg0: i32, %arg1: memref<16xi32, #tpu.memory_space<smem>>) -> (i32, i32) {
    %c0_i32 = arith.constant 0 : i32
    %c0_i32_0 = arith.constant 0 : i32
    return %arg0, %c0_i32 : i32, i32
  }
}

</mosaic_0001>

<bundles_post_ra>
// kernel: tpu_custom_call.1
= control target key start
LH: loop header
LB: loop body
LE: loop exit
PB: predicated region body
PF: predicated region fallthrough
CT: control target
= control target key end

     0   :  { %s1977_s0 = inlined_call_operand.hbm [shape: s32[16], index: 0, kind: input, shape index: {}]   ;;  %s1978_s1 = inlined_call_operand.hbm [shape: f32[64,128], index: 1, kind: input, shape index: {}]   ;;  %s1979_s2 = inlined_call_operand.hbm [shape: f32[16,128], index: 2, kind: output, shape index: {}]  }
   0x1   :  { %s1203_s11 = scalar_lea.hbm %s1977_s0, 16 }
   0x2   :  { %p1204_p0 = scmp.ne.s32.totalorder %s1977_s0, %s1203_s11  ;;  %p1207_p1 = scmp.lt.u32.totalorder %s1203_s11, %s1977_s0 }
   0x4   :  { %p1209_p2 = pnand %p1207_p1, %p1204_p0 }
   0x6   :  { %1212 = shalt.err (!%p1209_p2)  }
   0x7   :  { %s1655_s16 = smov [#allocation5]  }
   0x8   :  { %8 = dma.hbm_to_smem %s1977_s0, 16, %s1655_s16, [#allocation4] }
   0x9   :  { %1619 = dma.done.wait [#allocation4], 16 }
   0xa   :  { %1620 = vsyncadd [#allocation4], 4294967280 }
   0xb   :  { %10 = sfence }
   0xc   :  { %11 = vsyncpa [#allocation7], 0  ;;  %s24_s19 = sld [smem:[#allocation5]]  ;;  %s1656_s20 = smov [#allocation2]  }
   0xd   :  { %s34_s21 = sshll.u32 %s1656_s20, 4  ;;  %s1702_s22 = sld [smem:[#allocation5 + $0x1]]  ;;  %s1704_s21 = int_to_ptr.vmem [resolvable:$true] %s34_s21 }
   0xe   :  { %s1657_s23 = smov [#allocation2 + $0x1]   ;;  %s1706_s25 = sld [smem:[#allocation5 + $0x2]] }
   0xf   :  { %s50_s24 = sshll.u32 %s1657_s23, 4  ;;  %s1658_s26 = smov [#allocation2 + $0x2]   ;;  %s1708_s24 = int_to_ptr.vmem [resolvable:$true] %s50_s24 }
  0x10   :  { %s66_s0 = sshll.u32 %s1658_s26, 4  ;;  %s1710_s27 = sld [smem:[#allocation5 + $0x3]]  ;;  %s1712_s0 = int_to_ptr.vmem [resolvable:$true] %s66_s0 }
  0x11   :  { %s1721_s8 = scalar_lea.hbm %s1978_s1, 1024 }
  0x12   :  { %s1088_s28 = sshll.u32 %s24_s19, 4 }
  0x13   :  { %s26_s3 = scalar_lea.hbm %s1978_s1, %s1088_s28  ;;  %s1090_s4 = sshll.u32 %s1702_s22, 4 }
  0x14   :  { %s1213_s5 = scalar_lea.hbm %s26_s3, 16  ;;  %p1216_p4 = scmp.lt.u32.totalorder %s26_s3, %s1978_s1 }
  0x15   :  { %p1214_p3 = scmp.ne.s32.totalorder %s26_s3, %s1213_s5  ;;  %p1217_p5 = scmp.lt.u32.totalorder %s1721_s8, %s1213_s5 }
  0x16   :  { %p1219_p7 = scmp.lt.u32.totalorder %s1213_s5, %s26_s3 }
  0x17   :  { %p1218_p6 = por %p1217_p5, %p1216_p4 }
  0x19   :  { %p1220_p8 = por %p1219_p7, %p1218_p6 }
  0x1b   :  { %p1221_p9 = pnand %p1220_p8, %p1214_p3 }
  0x1d   :  { %1224 = shalt.err (!%p1221_p9)  }
  0x1e   :  { %s1225_s11 = scalar_lea.vmem %s1704_s21, 16  ;;  %s1730_s12 = scalar_lea.vmem %s1704_s21, 512 }
  0x1f   :  { %p1226_p10 = scmp.ne.s32.totalorder %s1704_s21, %s1225_s11  ;;  %p1230_p11 = scmp.lt.s32.totalorder %s1704_s21, %s1704_s21 }
  0x20   :  { %p1231_p12 = scmp.lt.s32.totalorder %s1730_s12, %s1225_s11 }
  0x22   :  { %p1232_p13 = por %p1231_p12, %p1230_p11 }
  0x24   :  { %p1233_p0 = pnand %p1232_p13, %p1226_p10 }
  0x26   :  { %1236 = shalt.err (!%p1233_p0)  }
  0x27   :  { %37 = dma.hbm_to_vmem [thread:$0]  %s26_s3, 16, %s1704_s21, [#allocation3] }
  0x28   :  { %s40_s15 = scalar_lea.hbm %s1978_s1, %s1090_s4  ;;  %s1092_s16 = sshll.u32 %s1706_s25, 4 }
  0x29   :  { %s1237_s17 = scalar_lea.hbm %s40_s15, 16  ;;  %p1240_p2 = scmp.lt.u32.totalorder %s40_s15, %s1978_s1 }
  0x2a   :  { %p1238_p1 = scmp.ne.s32.totalorder %s40_s15, %s1237_s17  ;;  %p1241_p3 = scmp.lt.u32.totalorder %s1721_s8, %s1237_s17 }
  0x2b   :  { %p1243_p5 = scmp.lt.u32.totalorder %s1237_s17, %s40_s15 }
  0x2c   :  { %p1242_p4 = por %p1241_p3, %p1240_p2 }
  0x2e   :  { %p1244_p6 = por %p1243_p5, %p1242_p4 }
  0x30   :  { %p1245_p7 = pnand %p1244_p6, %p1238_p1 }
  0x32   :  { %1248 = shalt.err (!%p1245_p7)  }
  0x33   :  { %s1249_s20 = scalar_lea.vmem %s1708_s24, 16  ;;  %p1254_p9 = scmp.lt.s32.totalorder %s1708_s24, %s1704_s21 }
  0x34   :  { %p1250_p8 = scmp.ne.s32.totalorder %s1708_s24, %s1249_s20  ;;  %p1255_p10 = scmp.lt.s32.totalorder %s1730_s12, %s1249_s20 }
  0x36   :  { %p1256_p11 = por %p1255_p10, %p1254_p9 }
  0x38   :  { %p1257_p12 = pnand %p1256_p11, %p1250_p8 }
  0x3a   :  { %1260 = shalt.err (!%p1257_p12)  }
  0x3b   :  { %53 = dma.hbm_to_vmem [thread:$0]  %s40_s15, 16, %s1708_s24, [#allocation3 + $0x1] }
  0x3c   :  { %s56_s25 = scalar_lea.hbm %s1978_s1, %s1092_s16  ;;  %s1094_s26 = sshll.u32 %s1710_s27, 4 }
  0x3d   :  { %s1261_s28 = scalar_lea.hbm %s56_s25, 16  ;;  %p1264_p0 = scmp.lt.u32.totalorder %s56_s25, %s1978_s1 }
  0x3e   :  { %p1262_p13 = scmp.ne.s32.totalorder %s56_s25, %s1261_s28  ;;  %p1265_p1 = scmp.lt.u32.totalorder %s1721_s8, %s1261_s28 }
  0x3f   :  { %p1267_p3 = scmp.lt.u32.totalorder %s1261_s28, %s56_s25 }
  0x40   :  { %p1266_p2 = por %p1265_p1, %p1264_p0 }
  0x42   :  { %p1268_p4 = por %p1267_p3, %p1266_p2 }
  0x44   :  { %p1269_p5 = pnand %p1268_p4, %p1262_p13 }
  0x46   :  { %1272 = shalt.err (!%p1269_p5)  }
  0x47   :  { %s1273_s24 = scalar_lea.vmem %s1712_s0, 16  ;;  %p1278_p7 = scmp.lt.s32.totalorder %s1712_s0, %s1704_s21 }
  0x48   :  { %p1274_p6 = scmp.ne.s32.totalorder %s1712_s0, %s1273_s24  ;;  %p1279_p8 = scmp.lt.s32.totalorder %s1730_s12, %s1273_s24 }
  0x4a   :  { %p1280_p9 = por %p1279_p8, %p1278_p7 }
  0x4c   :  { %p1281_p10 = pnand %p1280_p9, %p1274_p6 }
  0x4e   :  { %1284 = shalt.err (!%p1281_p10)  }
  0x4f   :  { %69 = dma.hbm_to_vmem [thread:$0]  %s56_s25, 16, %s1712_s0, [#allocation3 + $0x2] }
  0x50   :  { %s72_s4 = scalar_lea.hbm %s1978_s1, %s1094_s26  ;;  %s1659_s5 = smov [#allocation2 + $0x3]  }
  0x51   :  { %s82_s6 = sshll.u32 %s1659_s5, 4  ;;  %s1767_s7 = sld [smem:[#allocation5 + $0x4]]  ;;  %s83_s6 = int_to_ptr.vmem [resolvable:$true] %s82_s6 }
  0x52   :  { %s1285_s9 = scalar_lea.hbm %s72_s4, 16  ;;  %p1288_p12 = scmp.lt.u32.totalorder %s72_s4, %s1978_s1 }
  0x53   :  { %p1286_p11 = scmp.ne.s32.totalorder %s72_s4, %s1285_s9  ;;  %p1289_p13 = scmp.lt.u32.totalorder %s1721_s8, %s1285_s9 }
  0x54   :  { %p1291_p1 = scmp.lt.u32.totalorder %s1285_s9, %s72_s4 }
  0x55   :  { %p1290_p0 = por %p1289_p13, %p1288_p12 }
  0x57   :  { %p1292_p2 = por %p1291_p1, %p1290_p0 }
  0x59   :  { %p1293_p3 = pnand %p1292_p2, %p1286_p11 }
  0x5b   :  { %1296 = shalt.err (!%p1293_p3)  }
  0x5c   :  { %s1297_s0 = scalar_lea.vmem %s83_s6, 16  ;;  %p1302_p5 = scmp.lt.s32.totalorder %s83_s6, %s1704_s21 }
  0x5d   :  { %p1298_p4 = scmp.ne.s32.totalorder %s83_s6, %s1297_s0  ;;  %p1303_p6 = scmp.lt.s32.totalorder %s1730_s12, %s1297_s0 }
  0x5f   :  { %p1304_p7 = por %p1303_p6, %p1302_p5 }
  0x61   :  { %p1305_p8 = pnand %p1304_p7, %p1298_p4 }
  0x63   :  { %1308 = shalt.err (!%p1305_p8)  }
  0x64   :  { %85 = dma.hbm_to_vmem [thread:$0]  %s72_s4, 16, %s83_s6, [#allocation3 + $0x3] }
  0x65   :  { %s1660_s13 = smov [#allocation2 + $0x4]   ;;  %s1775_s15 = sld [smem:[#allocation5 + $0x5]] }
  0x66   :  { %s98_s14 = sshll.u32 %s1660_s13, 4  ;;  %s1661_s16 = smov [#allocation2 + $0x5]   ;;  %s99_s14 = int_to_ptr.vmem [resolvable:$true] %s98_s14 }
  0x67   :  { %s114_s17 = sshll.u32 %s1661_s16, 4  ;;  %s1777_s18 = sld [smem:[#allocation5 + $0x6]]  ;;  %s1780_s17 = int_to_ptr.vmem [resolvable:$true] %s114_s17 }
  0x68   :  { %s1096_s19 = sshll.u32 %s1767_s7, 4 }
  0x69   :  { %s88_s23 = scalar_lea.hbm %s1978_s1, %s1096_s19 }
  0x6a   :  { %s1309_s25 = scalar_lea.hbm %s88_s23, 16  ;;  %p1312_p10 = scmp.lt.u32.totalorder %s88_s23, %s1978_s1 }
  0x6b   :  { %p1310_p9 = scmp.ne.s32.totalorder %s88_s23, %s1309_s25  ;;  %p1313_p11 = scmp.lt.u32.totalorder %s1721_s8, %s1309_s25 }
  0x6c   :  { %p1315_p13 = scmp.lt.u32.totalorder %s1309_s25, %s88_s23 }
  0x6d   :  { %p1314_p12 = por %p1313_p11, %p1312_p10 }
  0x6f   :  { %p1316_p0 = por %p1315_p13, %p1314_p12 }
  0x71   :  { %p1317_p1 = pnand %p1316_p0, %p1310_p9 }
  0x73   :  { %1320 = shalt.err (!%p1317_p1)  }
  0x74   :  { %s1321_s29 = scalar_lea.vmem %s99_s14, 16  ;;  %p1326_p3 = scmp.lt.s32.totalorder %s99_s14, %s1704_s21 }
  0x75   :  { %p1322_p2 = scmp.ne.s32.totalorder %s99_s14, %s1321_s29  ;;  %p1327_p4 = scmp.lt.s32.totalorder %s1730_s12, %s1321_s29 }
  0x77   :  { %p1328_p5 = por %p1327_p4, %p1326_p3 }
  0x79   :  { %p1329_p6 = pnand %p1328_p5, %p1322_p2 }
  0x7b   :  { %1332 = shalt.err (!%p1329_p6)  }
  0x7c   :  { %101 = dma.hbm_to_vmem [thread:$0]  %s88_s23, 16, %s99_s14, [#allocation3 + $0x4] }
  0x7d   :  { %s1098_s30 = sshll.u32 %s1775_s15, 4  ;;  %s1662_s24 = smov [#allocation2 + $0x6]  }
  0x7e   :  { %s130_s27 = sshll.u32 %s1662_s24, 4  ;;  %s104_s5 = scalar_lea.hbm %s1978_s1, %s1098_s30  ;;  %s1795_s27 = int_to_ptr.vmem [resolvable:$true] %s130_s27 }
  0x7f   :  { %s1333_s6 = scalar_lea.hbm %s104_s5, 16  ;;  %p1336_p8 = scmp.lt.u32.totalorder %s104_s5, %s1978_s1 }
  0x80   :  { %p1334_p7 = scmp.ne.s32.totalorder %s104_s5, %s1333_s6  ;;  %p1337_p9 = scmp.lt.u32.totalorder %s1721_s8, %s1333_s6 }
  0x81   :  { %p1339_p11 = scmp.lt.u32.totalorder %s1333_s6, %s104_s5 }
  0x82   :  { %p1338_p10 = por %p1337_p9, %p1336_p8 }
  0x84   :  { %p1340_p12 = por %p1339_p11, %p1338_p10 }
  0x86   :  { %p1341_p13 = pnand %p1340_p12, %p1334_p7 }
  0x88   :  { %1344 = shalt.err (!%p1341_p13)  }
  0x89   :  { %s1345_s10 = scalar_lea.vmem %s1780_s17, 16  ;;  %p1350_p1 = scmp.lt.s32.totalorder %s1780_s17, %s1704_s21 }
  0x8a   :  { %p1346_p0 = scmp.ne.s32.totalorder %s1780_s17, %s1345_s10  ;;  %p1351_p2 = scmp.lt.s32.totalorder %s1730_s12, %s1345_s10 }
  0x8c   :  { %p1352_p3 = por %p1351_p2, %p1350_p1 }
  0x8e   :  { %p1353_p4 = pnand %p1352_p3, %p1346_p0 }
  0x90   :  { %1356 = shalt.err (!%p1353_p4)  }
  0x91   :  { %117 = dma.hbm_to_vmem [thread:$0]  %s104_s5, 16, %s1780_s17, [#allocation3 + $0x5] }
  0x92   :  { %s1100_s11 = sshll.u32 %s1777_s18, 4  ;;  %s1808_s0 = sld [smem:[#allocation5 + $0x7]] }
  0x93   :  { %s120_s15 = scalar_lea.hbm %s1978_s1, %s1100_s11 }
  0x94   :  { %s1357_s16 = scalar_lea.hbm %s120_s15, 16  ;;  %p1360_p6 = scmp.lt.u32.totalorder %s120_s15, %s1978_s1 }
  0x95   :  { %p1358_p5 = scmp.ne.s32.totalorder %s120_s15, %s1357_s16  ;;  %p1361_p7 = scmp.lt.u32.totalorder %s1721_s8, %s1357_s16 }
  0x96   :  { %p1363_p9 = scmp.lt.u32.totalorder %s1357_s16, %s120_s15 }
  0x97   :  { %p1362_p8 = por %p1361_p7, %p1360_p6 }
  0x99   :  { %p1364_p10 = por %p1363_p9, %p1362_p8 }
  0x9b   :  { %p1365_p11 = pnand %p1364_p10, %p1358_p5 }
  0x9d   :  { %1368 = shalt.err (!%p1365_p11)  }
  0x9e   :  { %s1369_s17 = scalar_lea.vmem %s1795_s27, 16  ;;  %p1374_p13 = scmp.lt.s32.totalorder %s1795_s27, %s1704_s21 }
  0x9f   :  { %p1370_p12 = scmp.ne.s32.totalorder %s1795_s27, %s1369_s17  ;;  %p1375_p0 = scmp.lt.s32.totalorder %s1730_s12, %s1369_s17 }
  0xa1   :  { %p1376_p1 = por %p1375_p0, %p1374_p13 }
  0xa3   :  { %p1377_p2 = pnand %p1376_p1, %p1370_p12 }
  0xa5   :  { %1380 = shalt.err (!%p1377_p2)  }
  0xa6   :  { %133 = dma.hbm_to_vmem [thread:$0]  %s120_s15, 16, %s1795_s27, [#allocation3 + $0x6] }
  0xa7   :  { %s1663_s18 = smov [#allocation2 + $0x7]   ;;  %s1823_s23 = sld [smem:[#allocation5 + $0x8]] }
  0xa8   :  { %s146_s22 = sshll.u32 %s1663_s18, 4  ;;  %s1664_s25 = smov [#allocation2 + $0x8]   ;;  %s147_s22 = int_to_ptr.vmem [resolvable:$true] %s146_s22 }
  0xa9   :  { %s162_s26 = sshll.u32 %s1664_s25, 4  ;;  %s1825_s28 = sld [smem:[#allocation5 + $0x9]]  ;;  %s1828_s26 = int_to_ptr.vmem [resolvable:$true] %s162_s26 }
  0xaa   :  { %s1102_s29 = sshll.u32 %s1808_s0, 4 }
  0xab   :  { %s136_s3 = scalar_lea.hbm %s1978_s1, %s1102_s29 }
  0xac   :  { %s1381_s4 = scalar_lea.hbm %s136_s3, 16  ;;  %p1384_p4 = scmp.lt.u32.totalorder %s136_s3, %s1978_s1 }
  0xad   :  { %p1382_p3 = scmp.ne.s32.totalorder %s136_s3, %s1381_s4  ;;  %p1385_p5 = scmp.lt.u32.totalorder %s1721_s8, %s1381_s4 }
  0xae   :  { %p1387_p7 = scmp.lt.u32.totalorder %s1381_s4, %s136_s3 }
  0xaf   :  { %p1386_p6 = por %p1385_p5, %p1384_p4 }
  0xb1   :  { %p1388_p8 = por %p1387_p7, %p1386_p6 }
  0xb3   :  { %p1389_p9 = pnand %p1388_p8, %p1382_p3 }
  0xb5   :  { %1392 = shalt.err (!%p1389_p9)  }
  0xb6   :  { %s1393_s6 = scalar_lea.vmem %s147_s22, 16  ;;  %p1398_p11 = scmp.lt.s32.totalorder %s147_s22, %s1704_s21 }
  0xb7   :  { %p1394_p10 = scmp.ne.s32.totalorder %s147_s22, %s1393_s6  ;;  %p1399_p12 = scmp.lt.s32.totalorder %s1730_s12, %s1393_s6 }
  0xb9   :  { %p1400_p13 = por %p1399_p12, %p1398_p11 }
  0xbb   :  { %p1401_p0 = pnand %p1400_p13, %p1394_p10 }
  0xbd   :  { %1404 = shalt.err (!%p1401_p0)  }
  0xbe   :  { %149 = dma.hbm_to_vmem [thread:$0]  %s136_s3, 16, %s147_s22, [#allocation3 + $0x7] }
  0xbf   :  { %s1104_s7 = sshll.u32 %s1823_s23, 4  ;;  %s1665_s9 = smov [#allocation2 + $0x9]  }
  0xc0   :  { %s178_s10 = sshll.u32 %s1665_s9, 4  ;;  %s152_s13 = scalar_lea.hbm %s1978_s1, %s1104_s7  ;;  %s1843_s10 = int_to_ptr.vmem [resolvable:$true] %s178_s10 }
  0xc1   :  { %s1405_s14 = scalar_lea.hbm %s152_s13, 16  ;;  %p1408_p2 = scmp.lt.u32.totalorder %s152_s13, %s1978_s1 }
  0xc2   :  { %p1406_p1 = scmp.ne.s32.totalorder %s152_s13, %s1405_s14  ;;  %p1409_p3 = scmp.lt.u32.totalorder %s1721_s8, %s1405_s14 }
  0xc3   :  { %p1411_p5 = scmp.lt.u32.totalorder %s1405_s14, %s152_s13 }
  0xc4   :  { %p1410_p4 = por %p1409_p3, %p1408_p2 }
  0xc6   :  { %p1412_p6 = por %p1411_p5, %p1410_p4 }
  0xc8   :  { %p1413_p7 = pnand %p1412_p6, %p1406_p1 }
  0xca   :  { %1416 = shalt.err (!%p1413_p7)  }
  0xcb   :  { %s1417_s19 = scalar_lea.vmem %s1828_s26, 16  ;;  %p1422_p9 = scmp.lt.s32.totalorder %s1828_s26, %s1704_s21 }
  0xcc   :  { %p1418_p8 = scmp.ne.s32.totalorder %s1828_s26, %s1417_s19  ;;  %p1423_p10 = scmp.lt.s32.totalorder %s1730_s12, %s1417_s19 }
  0xce   :  { %p1424_p11 = por %p1423_p10, %p1422_p9 }
  0xd0   :  { %p1425_p12 = pnand %p1424_p11, %p1418_p8 }
  0xd2   :  { %1428 = shalt.err (!%p1425_p12)  }
  0xd3   :  { %165 = dma.hbm_to_vmem [thread:$0]  %s152_s13, 16, %s1828_s26, [#allocation3 + $0x8] }
  0xd4   :  { %s1106_s20 = sshll.u32 %s1825_s28, 4  ;;  %s1856_s17 = sld [smem:[#allocation5 + $0xa]] }
  0xd5   :  { %s168_s23 = scalar_lea.hbm %s1978_s1, %s1106_s20 }
  0xd6   :  { %s1429_s25 = scalar_lea.hbm %s168_s23, 16  ;;  %p1432_p0 = scmp.lt.u32.totalorder %s168_s23, %s1978_s1 }
  0xd7   :  { %p1430_p13 = scmp.ne.s32.totalorder %s168_s23, %s1429_s25  ;;  %p1433_p1 = scmp.lt.u32.totalorder %s1721_s8, %s1429_s25 }
  0xd8   :  { %p1435_p3 = scmp.lt.u32.totalorder %s1429_s25, %s168_s23 }
  0xd9   :  { %p1434_p2 = por %p1433_p1, %p1432_p0 }
  0xdb   :  { %p1436_p4 = por %p1435_p3, %p1434_p2 }
  0xdd   :  { %p1437_p5 = pnand %p1436_p4, %p1430_p13 }
  0xdf   :  { %1440 = shalt.err (!%p1437_p5)  }
  0xe0   :  { %s1441_s26 = scalar_lea.vmem %s1843_s10, 16  ;;  %p1446_p7 = scmp.lt.s32.totalorder %s1843_s10, %s1704_s21 }
  0xe1   :  { %p1442_p6 = scmp.ne.s32.totalorder %s1843_s10, %s1441_s26  ;;  %p1447_p8 = scmp.lt.s32.totalorder %s1730_s12, %s1441_s26 }
  0xe3   :  { %p1448_p9 = por %p1447_p8, %p1446_p7 }
  0xe5   :  { %p1449_p10 = pnand %p1448_p9, %p1442_p6 }
  0xe7   :  { %1452 = shalt.err (!%p1449_p10)  }
  0xe8   :  { %181 = dma.hbm_to_vmem [thread:$0]  %s168_s23, 16, %s1843_s10, [#allocation3 + $0x9] }
  0xe9   :  { %s1666_s28 = smov [#allocation2 + $0xa]   ;;  %s1871_s3 = sld [smem:[#allocation5 + $0xb]] }
  0xea   :  { %s194_s24 = sshll.u32 %s1666_s28, 4  ;;  %s1667_s4 = smov [#allocation2 + $0xb]   ;;  %s195_s24 = int_to_ptr.vmem [resolvable:$true] %s194_s24 }
  0xeb   :  { %s210_s5 = sshll.u32 %s1667_s4, 4  ;;  %s1873_s27 = sld [smem:[#allocation5 + $0xc]]  ;;  %s1876_s5 = int_to_ptr.vmem [resolvable:$true] %s210_s5 }
  0xec   :  { %s1108_s6 = sshll.u32 %s1856_s17, 4 }
  0xed   :  { %s184_s11 = scalar_lea.hbm %s1978_s1, %s1108_s6 }
  0xee   :  { %s1453_s0 = scalar_lea.hbm %s184_s11, 16  ;;  %p1456_p12 = scmp.lt.u32.totalorder %s184_s11, %s1978_s1 }
  0xef   :  { %p1454_p11 = scmp.ne.s32.totalorder %s184_s11, %s1453_s0  ;;  %p1457_p13 = scmp.lt.u32.totalorder %s1721_s8, %s1453_s0 }
  0xf0   :  { %p1459_p1 = scmp.lt.u32.totalorder %s1453_s0, %s184_s11 }
  0xf1   :  { %p1458_p0 = por %p1457_p13, %p1456_p12 }
  0xf3   :  { %p1460_p2 = por %p1459_p1, %p1458_p0 }
  0xf5   :  { %p1461_p3 = pnand %p1460_p2, %p1454_p11 }
  0xf7   :  { %1464 = shalt.err (!%p1461_p3)  }
  0xf8   :  { %s1465_s14 = scalar_lea.vmem %s195_s24, 16  ;;  %p1470_p5 = scmp.lt.s32.totalorder %s195_s24, %s1704_s21 }
  0xf9   :  { %p1466_p4 = scmp.ne.s32.totalorder %s195_s24, %s1465_s14  ;;  %p1471_p6 = scmp.lt.s32.totalorder %s1730_s12, %s1465_s14 }
  0xfb   :  { %p1472_p7 = por %p1471_p6, %p1470_p5 }
  0xfd   :  { %p1473_p8 = pnand %p1472_p7, %p1466_p4 }
  0xff   :  { %1476 = shalt.err (!%p1473_p8)  }
 0x100   :  { %197 = dma.hbm_to_vmem [thread:$0]  %s184_s11, 16, %s195_s24, [#allocation3 + $0xa] }
 0x101   :  { %s1110_s15 = sshll.u32 %s1871_s3, 4  ;;  %s1668_s16 = smov [#allocation2 + $0xc]  }
 0x102   :  { %s226_s19 = sshll.u32 %s1668_s16, 4  ;;  %s200_s18 = scalar_lea.hbm %s1978_s1, %s1110_s15  ;;  %s1891_s19 = int_to_ptr.vmem [resolvable:$true] %s226_s19 }
 0x103   :  { %s1477_s22 = scalar_lea.hbm %s200_s18, 16  ;;  %p1480_p10 = scmp.lt.u32.totalorder %s200_s18, %s1978_s1 }
 0x104   :  { %p1478_p9 = scmp.ne.s32.totalorder %s200_s18, %s1477_s22  ;;  %p1481_p11 = scmp.lt.u32.totalorder %s1721_s8, %s1477_s22 }
 0x105   :  { %p1483_p13 = scmp.lt.u32.totalorder %s1477_s22, %s200_s18 }
 0x106   :  { %p1482_p12 = por %p1481_p11, %p1480_p10 }
 0x108   :  { %p1484_p0 = por %p1483_p13, %p1482_p12 }
 0x10a   :  { %p1485_p1 = pnand %p1484_p0, %p1478_p9 }
 0x10c   :  { %1488 = shalt.err (!%p1485_p1)  }
 0x10d   :  { %s1489_s29 = scalar_lea.vmem %s1876_s5, 16  ;;  %p1494_p3 = scmp.lt.s32.totalorder %s1876_s5, %s1704_s21 }
 0x10e   :  { %p1490_p2 = scmp.ne.s32.totalorder %s1876_s5, %s1489_s29  ;;  %p1495_p4 = scmp.lt.s32.totalorder %s1730_s12, %s1489_s29 }
 0x110   :  { %p1496_p5 = por %p1495_p4, %p1494_p3 }
 0x112   :  { %p1497_p6 = pnand %p1496_p5, %p1490_p2 }
 0x114   :  { %1500 = shalt.err (!%p1497_p6)  }
 0x115   :  { %213 = dma.hbm_to_vmem [thread:$0]  %s200_s18, 16, %s1876_s5, [#allocation3 + $0xb] }
 0x116   :  { %s1112_s30 = sshll.u32 %s1873_s27, 4  ;;  %s1904_s26 = sld [smem:[#allocation5 + $0xd]] }
 0x117   :  { %s216_s3 = scalar_lea.hbm %s1978_s1, %s1112_s30 }
 0x118   :  { %s1501_s4 = scalar_lea.hbm %s216_s3, 16  ;;  %p1504_p8 = scmp.lt.u32.totalorder %s216_s3, %s1978_s1 }
 0x119   :  { %p1502_p7 = scmp.ne.s32.totalorder %s216_s3, %s1501_s4  ;;  %p1505_p9 = scmp.lt.u32.totalorder %s1721_s8, %s1501_s4 }
 0x11a   :  { %p1507_p11 = scmp.lt.u32.totalorder %s1501_s4, %s216_s3 }
 0x11b   :  { %p1506_p10 = por %p1505_p9, %p1504_p8 }
 0x11d   :  { %p1508_p12 = por %p1507_p11, %p1506_p10 }
 0x11f   :  { %p1509_p13 = pnand %p1508_p12, %p1502_p7 }
 0x121   :  { %1512 = shalt.err (!%p1509_p13)  }
 0x122   :  { %s1513_s5 = scalar_lea.vmem %s1891_s19, 16  ;;  %p1518_p1 = scmp.lt.s32.totalorder %s1891_s19, %s1704_s21 }
 0x123   :  { %p1514_p0 = scmp.ne.s32.totalorder %s1891_s19, %s1513_s5  ;;  %p1519_p2 = scmp.lt.s32.totalorder %s1730_s12, %s1513_s5 }
 0x125   :  { %p1520_p3 = por %p1519_p2, %p1518_p1 }
 0x127   :  { %p1521_p4 = pnand %p1520_p3, %p1514_p0 }
 0x129   :  { %1524 = shalt.err (!%p1521_p4)  }
 0x12a   :  { %229 = dma.hbm_to_vmem [thread:$0]  %s216_s3, 16, %s1891_s19, [#allocation3 + $0xc] }
 0x12b   :  { %s1669_s27 = smov [#allocation2 + $0xd]   ;;  %s1919_s11 = sld [smem:[#allocation5 + $0xe]] }
 0x12c   :  { %s242_s9 = sshll.u32 %s1669_s27, 4  ;;  %s1670_s0 = smov [#allocation2 + $0xe]   ;;  %s243_s9 = int_to_ptr.vmem [resolvable:$true] %s242_s9 }
 0x12d   :  { %s258_s13 = sshll.u32 %s1670_s0, 4  ;;  %s1921_s10 = sld [smem:[#allocation5 + $0xf]]  ;;  %s1924_s13 = int_to_ptr.vmem [resolvable:$true] %s258_s13 }
 0x12e   :  { %s1114_s14 = sshll.u32 %s1904_s26, 4 }
 0x12f   :  { %s232_s20 = scalar_lea.hbm %s1978_s1, %s1114_s14 }
 0x130   :  { %s1525_s17 = scalar_lea.hbm %s232_s20, 16  ;;  %p1528_p6 = scmp.lt.u32.totalorder %s232_s20, %s1978_s1 }
 0x131   :  { %p1526_p5 = scmp.ne.s32.totalorder %s232_s20, %s1525_s17  ;;  %p1529_p7 = scmp.lt.u32.totalorder %s1721_s8, %s1525_s17 }
 0x132   :  { %p1531_p9 = scmp.lt.u32.totalorder %s1525_s17, %s232_s20 }
 0x133   :  { %p1530_p8 = por %p1529_p7, %p1528_p6 }
 0x135   :  { %p1532_p10 = por %p1531_p9, %p1530_p8 }
 0x137   :  { %p1533_p11 = pnand %p1532_p10, %p1526_p5 }
 0x139   :  { %1536 = shalt.err (!%p1533_p11)  }
 0x13a   :  { %s1537_s22 = scalar_lea.vmem %s243_s9, 16  ;;  %p1542_p13 = scmp.lt.s32.totalorder %s243_s9, %s1704_s21 }
 0x13b   :  { %p1538_p12 = scmp.ne.s32.totalorder %s243_s9, %s1537_s22  ;;  %p1543_p0 = scmp.lt.s32.totalorder %s1730_s12, %s1537_s22 }
 0x13d   :  { %p1544_p1 = por %p1543_p0, %p1542_p13 }
 0x13f   :  { %p1545_p2 = pnand %p1544_p1, %p1538_p12 }
 0x141   :  { %1548 = shalt.err (!%p1545_p2)  }
 0x142   :  { %245 = dma.hbm_to_vmem [thread:$0]  %s232_s20, 16, %s243_s9, [#allocation3 + $0xd] }
 0x143   :  { %s1116_s23 = sshll.u32 %s1919_s11, 4  ;;  %s1671_s25 = smov [#allocation2 + $0xf]  }
 0x144   :  { %s274_s29 = sshll.u32 %s1671_s25, 4  ;;  %s248_s28 = scalar_lea.hbm %s1978_s1, %s1116_s23  ;;  %s1939_s29 = int_to_ptr.vmem [resolvable:$true] %s274_s29 }
 0x145   :  { %s1549_s24 = scalar_lea.hbm %s248_s28, 16  ;;  %p1552_p4 = scmp.lt.u32.totalorder %s248_s28, %s1978_s1 }
 0x146   :  { %p1550_p3 = scmp.ne.s32.totalorder %s248_s28, %s1549_s24  ;;  %p1553_p5 = scmp.lt.u32.totalorder %s1721_s8, %s1549_s24 }
 0x147   :  { %p1555_p7 = scmp.lt.u32.totalorder %s1549_s24, %s248_s28 }
 0x148   :  { %p1554_p6 = por %p1553_p5, %p1552_p4 }
 0x14a   :  { %p1556_p8 = por %p1555_p7, %p1554_p6 }
 0x14c   :  { %p1557_p9 = pnand %p1556_p8, %p1550_p3 }
 0x14e   :  { %1560 = shalt.err (!%p1557_p9)  }
 0x14f   :  { %s1561_s6 = scalar_lea.vmem %s1924_s13, 16  ;;  %p1566_p11 = scmp.lt.s32.totalorder %s1924_s13, %s1704_s21 }
 0x150   :  { %p1562_p10 = scmp.ne.s32.totalorder %s1924_s13, %s1561_s6  ;;  %p1567_p12 = scmp.lt.s32.totalorder %s1730_s12, %s1561_s6 }
 0x152   :  { %p1568_p13 = por %p1567_p12, %p1566_p11 }
 0x154   :  { %p1569_p0 = pnand %p1568_p13, %p1562_p10 }
 0x156   :  { %1572 = shalt.err (!%p1569_p0)  }
 0x157   :  { %261 = dma.hbm_to_vmem [thread:$0]  %s248_s28, 16, %s1924_s13, [#allocation3 + $0xe] }
 0x158   :  { %s1118_s7 = sshll.u32 %s1921_s10, 4 }
 0x159   :  { %s264_s9 = scalar_lea.hbm %s1978_s1, %s1118_s7 }
 0x15a   :  { %s1573_s11 = scalar_lea.hbm %s264_s9, 16  ;;  %p1576_p2 = scmp.lt.u32.totalorder %s264_s9, %s1978_s1 }
 0x15b   :  { %p1574_p1 = scmp.ne.s32.totalorder %s264_s9, %s1573_s11  ;;  %p1577_p3 = scmp.lt.u32.totalorder %s1721_s8, %s1573_s11 }
 0x15c   :  { %p1579_p5 = scmp.lt.u32.totalorder %s1573_s11, %s264_s9 }
 0x15d   :  { %p1578_p4 = por %p1577_p3, %p1576_p2 }
 0x15f   :  { %p1580_p6 = por %p1579_p5, %p1578_p4 }
 0x161   :  { %p1581_p7 = pnand %p1580_p6, %p1574_p1 }
 0x163   :  { %1584 = shalt.err (!%p1581_p7)  }
 0x164   :  { %s1585_s13 = scalar_lea.vmem %s1939_s29, 16  ;;  %p1590_p9 = scmp.lt.s32.totalorder %s1939_s29, %s1704_s21 }
 0x165   :  { %p1586_p8 = scmp.ne.s32.totalorder %s1939_s29, %s1585_s13  ;;  %p1591_p10 = scmp.lt.s32.totalorder %s1730_s12, %s1585_s13 }
 0x167   :  { %p1592_p11 = por %p1591_p10, %p1590_p9 }
 0x169   :  { %p1593_p12 = pnand %p1592_p11, %p1586_p8 }
 0x16b   :  { %1596 = shalt.err (!%p1593_p12)  }
 0x16c   :  { %277 = dma.hbm_to_vmem [thread:$0]  %s264_s9, 16, %s1939_s29, [#allocation3 + $0xf] }
 0x16d   :  { %1621 = dma.done.wait [#allocation3], 16 }
 0x16e   :  { %1622 = vsyncadd [#allocation3], 4294967280 }
 0x16f   :  { %1623 = dma.done.wait [#allocation3 + $0x1], 16 }
 0x170   :  { %1624 = vsyncadd [#allocation3 + $0x1], 4294967280 }
 0x171   :  { %1625 = dma.done.wait [#allocation3 + $0x2], 16 }
 0x172   :  { %1626 = vsyncadd [#allocation3 + $0x2], 4294967280 }
 0x173   :  { %1627 = dma.done.wait [#allocation3 + $0x3], 16 }
 0x174   :  { %1628 = vsyncadd [#allocation3 + $0x3], 4294967280 }
 0x175   :  { %1629 = dma.done.wait [#allocation3 + $0x4], 16 }
 0x176   :  { %1630 = vsyncadd [#allocation3 + $0x4], 4294967280 }
 0x177   :  { %1631 = dma.done.wait [#allocation3 + $0x5], 16 }
 0x178   :  { %1632 = vsyncadd [#allocation3 + $0x5], 4294967280 }
 0x179   :  { %1633 = dma.done.wait [#allocation3 + $0x6], 16 }
 0x17a   :  { %1634 = vsyncadd [#allocation3 + $0x6], 4294967280 }
 0x17b   :  { %1635 = dma.done.wait [#allocation3 + $0x7], 16 }
 0x17c   :  { %1636 = vsyncadd [#allocation3 + $0x7], 4294967280 }
 0x17d   :  { %1637 = dma.done.wait [#allocation3 + $0x8], 16 }
 0x17e   :  { %1638 = vsyncadd [#allocation3 + $0x8], 4294967280 }
 0x17f   :  { %1639 = dma.done.wait [#allocation3 + $0x9], 16 }
 0x180   :  { %1640 = vsyncadd [#allocation3 + $0x9], 4294967280 }
 0x181   :  { %1641 = dma.done.wait [#allocation3 + $0xa], 16 }
 0x182   :  { %1642 = vsyncadd [#allocation3 + $0xa], 4294967280 }
 0x183   :  { %1643 = dma.done.wait [#allocation3 + $0xb], 16 }
 0x184   :  { %1644 = vsyncadd [#allocation3 + $0xb], 4294967280 }
 0x185   :  { %1645 = dma.done.wait [#allocation3 + $0xc], 16 }
 0x186   :  { %1646 = vsyncadd [#allocation3 + $0xc], 4294967280 }
 0x187   :  { %1647 = dma.done.wait [#allocation3 + $0xd], 16 }
 0x188   :  { %1648 = vsyncadd [#allocation3 + $0xd], 4294967280 }
 0x189   :  { %1649 = dma.done.wait [#allocation3 + $0xe], 16 }
 0x18a   :  { %1650 = vsyncadd [#allocation3 + $0xe], 4294967280 }
 0x18b   :  { %1651 = dma.done.wait [#allocation3 + $0xf], 16 }
 0x18c   :  { %1652 = vsyncadd [#allocation3 + $0xf], 4294967280  ;;  %s1672_s1 = smov [#allocation6]   ;;  %v638_v0 = vld [vmem:[#allocation2] sm:$0xff]  ;;  %v639_v1 = vld [vmem:[#allocation2 + $0x8] sm:$0xff] }
 0x18d   :  { %s647_s21 = sshll.u32 %s1672_s1, 4  ;;  %640 = vst [vmem:[#allocation6] sm:$0xff] %v638_v0  ;;  %641 = vst [vmem:[#allocation6 + $0x8] sm:$0xff] %v639_v1  ;;  %s648_s21 = int_to_ptr.vmem [resolvable:$true] %s647_s21 }
 0x18e   :  { %s1597_s8 = scalar_lea.vmem %s648_s21, 256  ;;  %p1602_p0 = scmp.lt.s32.totalorder %s648_s21, %s648_s21 }
 0x18f   :  { %p1598_p13 = scmp.ne.s32.totalorder %s648_s21, %s1597_s8  ;;  %p1603_p1 = scmp.lt.s32.totalorder %s1597_s8, %s1597_s8 }
 0x191   :  { %p1604_p2 = por %p1603_p1, %p1602_p0 }
 0x193   :  { %p1605_p3 = pnand %p1604_p2, %p1598_p13 }
 0x195   :  { %1608 = shalt.err (!%p1605_p3)
}
 0x196   :  { %s1609_s15 = scalar_lea.hbm %s1979_s2, 256 }
 0x197   :  { %p1610_p4 = scmp.ne.s32.totalorder %s1979_s2, %s1609_s15  ;;  %p1613_p5 = scmp.lt.u32.totalorder %s1609_s15, %s1979_s2 }
 0x199   :  { %p1615_p6 = pnand %p1613_p5, %p1610_p4 }
 0x19b   :  { %1618 = shalt.err (!%p1615_p6)
}
 0x19c   :  { %s1673_s19 = smov 128   ;;  %s1674_s22 = smov 8  }
 0x19d   :  { %653 = dma.vmem_to_hbm [thread:$0]  %s648_s21, 256, %s1979_s2, [#allocation7], %s1673_s19, %s1673_s19, %s1674_s22  }
 0x19e   :  { %1653 = dma.done.wait [#allocation7], 256  }
 0x19f   :  { %1654 = vsyncadd [#allocation7], 4294967040 }
 0x1a0   :  { %657 = vsyncpa [#allocation7], 1 }
 0x1a1   :  { %658 = vsyncmov [#allocation3] }
 0x1a4   :  { %s659_s29 = vpop.sfrf %658 }
 0x1a5   :  { %p1151_p7 = scmp.ne.s32.totalorder %s659_s29, 0 }
 0x1a7   :  { %663 = shalt.err (%p1151_p7)  }
 0x1a8   :  { %665 = vsyncmov [#allocation3 + $0x1] }
 0x1ab   :  { %s666_s30 = vpop.sfrf %665 }
 0x1ac   :  { %p1152_p8 = scmp.ne.s32.totalorder %s666_s30, 0 }
 0x1ae   :  { %670 = shalt.err (%p1152_p8)  }
 0x1af   :  { %672 = vsyncmov [#allocation3 + $0x2] }
 0x1b2   :  { %s673_s26 = vpop.sfrf %672 }
 0x1b3   :  { %p1153_p9 = scmp.ne.s32.totalorder %s673_s26, 0 }
 0x1b5   :  { %677 = shalt.err (%p1153_p9)  }
 0x1b6   :  { %679 = vsyncmov [#allocation3 + $0x3] }
 0x1b9   :  { %s680_s28 = vpop.sfrf %679 }
 0x1ba   :  { %p1154_p10 = scmp.ne.s32.totalorder %s680_s28, 0 }
 0x1bc   :  { %684 = shalt.err (%p1154_p10)  }
 0x1bd   :  { %686 = vsyncmov [#allocation3 + $0x4] }
 0x1c0   :  { %s687_s2 = vpop.sfrf %686 }
 0x1c1   :  { %p1155_p11 = scmp.ne.s32.totalorder %s687_s2, 0 }
 0x1c3   :  { %691 = shalt.err (%p1155_p11)  }
 0x1c4   :  { %693 = vsyncmov [#allocation3 + $0x5] }
 0x1c7   :  { %s694_s24 = vpop.sfrf %693 }
 0x1c8   :  { %p1156_p12 = scmp.ne.s32.totalorder %s694_s24, 0 }
 0x1ca   :  { %698 = shalt.err (%p1156_p12)  }
 0x1cb   :  { %700 = vsyncmov [#allocation3 + $0x6] }
 0x1ce   :  { %s701_s3 = vpop.sfrf %700 }
 0x1cf   :  { %p1157_p13 = scmp.ne.s32.totalorder %s701_s3, 0 }
 0x1d1   :  { %705 = shalt.err (%p1157_p13)  }
 0x1d2   :  { %707 = vsyncmov [#allocation3 + $0x7] }
 0x1d5   :  { %s708_s4 = vpop.sfrf %707 }
 0x1d6   :  { %p1158_p0 = scmp.ne.s32.totalorder %s708_s4, 0 }
 0x1d8   :  { %712 = shalt.err (%p1158_p0)  }
 0x1d9   :  { %714 = vsyncmov [#allocation3 + $0x8] }
 0x1dc   :  { %s715_s6 = vpop.sfrf %714 }
 0x1dd   :  { %p1159_p1 = scmp.ne.s32.totalorder %s715_s6, 0 }
 0x1df   :  { %719 = shalt.err (%p1159_p1)  }
 0x1e0   :  { %721 = vsyncmov [#allocation3 + $0x9] }
 0x1e3   :  { %s722_s7 = vpop.sfrf %721 }
 0x1e4   :  { %p1160_p2 = scmp.ne.s32.totalorder %s722_s7, 0 }
 0x1e6   :  { %726 = shalt.err (%p1160_p2)  }
 0x1e7   :  { %728 = vsyncmov [#allocation3 + $0xa] }
 0x1ea   :  { %s729_s5 = vpop.sfrf %728 }
 0x1eb   :  { %p1161_p3 = scmp.ne.s32.totalorder %s729_s5, 0 }
 0x1ed   :  { %733 = shalt.err (%p1161_p3)  }
 0x1ee   :  { %735 = vsyncmov [#allocation3 + $0xb] }
 0x1f1   :  { %s736_s27 = vpop.sfrf %735 }
 0x1f2   :  { %p1162_p4 = scmp.ne.s32.totalorder %s736_s27, 0 }
 0x1f4   :  { %740 = shalt.err (%p1162_p4)  }
 0x1f5   :  { %742 = vsyncmov [#allocation3 + $0xc] }
 0x1f8   :  { %s743_s9 = vpop.sfrf %742 }
 0x1f9   :  { %p1163_p5 = scmp.ne.s32.totalorder %s743_s9, 0 }
 0x1fb   :  { %747 = shalt.err (%p1163_p5)  }
 0x1fc   :  { %749 = vsyncmov [#allocation3 + $0xd] }
 0x1ff   :  { %s750_s11 = vpop.sfrf %749 }
 0x200   :  { %p1164_p6 = scmp.ne.s32.totalorder %s750_s11, 0 }
 0x202   :  { %754 = shalt.err (%p1164_p6)  }
 0x203   :  { %756 = vsyncmov [#allocation3 + $0xe] }
 0x206   :  { %s757_s0 = vpop.sfrf %756 }
 0x207   :  { %p1165_p7 = scmp.ne.s32.totalorder %s757_s0, 0 }
 0x209   :  { %761 = shalt.err (%p1165_p7)  }
 0x20a   :  { %763 = vsyncmov [#allocation3 + $0xf] }
 0x20d   :  { %s764_s14 = vpop.sfrf %763 }
 0x20e   :  { %p1166_p8 = scmp.ne.s32.totalorder %s764_s14, 0 }
 0x210   :  { %768 = shalt.err (%p1166_p8)  }
 0x211   :  { %770 = vsyncmov [#allocation3 + $0x10] }
 0x214   :  { %s771_s13 = vpop.sfrf %770 }
 0x215   :  { %p1167_p9 = scmp.ne.s32.totalorder %s771_s13, 0 }
 0x217   :  { %775 = shalt.err (%p1167_p9)  }
 0x218   :  { %777 = vsyncmov [#allocation3 + $0x11] }
 0x21b   :  { %s778_s1 = vpop.sfrf %777 }
 0x21c   :  { %p1168_p10 = scmp.ne.s32.totalorder %s778_s1, 0 }
 0x21e   :  { %782 = shalt.err (%p1168_p10)  }
 0x21f   :  { %784 = vsyncmov [#allocation3 + $0x12] }
 0x222   :  { %s785_s21 = vpop.sfrf %784 }
 0x223   :  { %p1169_p11 = scmp.ne.s32.totalorder %s785_s21, 0 }
 0x225   :  { %789 = shalt.err (%p1169_p11)  }
 0x226   :  { %791 = vsyncmov [#allocation3 + $0x13] }
 0x229   :  { %s792_s8 = vpop.sfrf %791 }
 0x22a   :  { %p1170_p12 = scmp.ne.s32.totalorder %s792_s8, 0 }
 0x22c   :  { %796 = shalt.err (%p1170_p12)  }
 0x22d   :  { %798 = vsyncmov [#allocation3 + $0x14] }
 0x230   :  { %s799_s12 = vpop.sfrf %798 }
 0x231   :  { %p1171_p13 = scmp.ne.s32.totalorder %s799_s12, 0 }
 0x233   :  { %803 = shalt.err (%p1171_p13)  }
 0x234   :  { %805 = vsyncmov [#allocation3 + $0x15] }
 0x237   :  { %s806_s10 = vpop.sfrf %805 }
 0x238   :  { %p1172_p0 = scmp.ne.s32.totalorder %s806_s10, 0 }
 0x23a   :  { %810 = shalt.err (%p1172_p0)  }
 0x23b   :  { %812 = vsyncmov [#allocation3 + $0x16] }
 0x23e   :  { %s813_s15 = vpop.sfrf %812 }
 0x23f   :  { %p1173_p1 = scmp.ne.s32.totalorder %s813_s15, 0 }
 0x241   :  { %817 = shalt.err (%p1173_p1)  }
 0x242   :  { %819 = vsyncmov [#allocation3 + $0x17] }
 0x245   :  { %s820_s16 = vpop.sfrf %819 }
 0x246   :  { %p1174_p2 = scmp.ne.s32.totalorder %s820_s16, 0 }
 0x248   :  { %824 = shalt.err (%p1174_p2)  }
 0x249   :  { %826 = vsyncmov [#allocation3 + $0x18] }
 0x24c   :  { %s827_s20 = vpop.sfrf %826 }
 0x24d   :  { %p1175_p3 = scmp.ne.s32.totalorder %s827_s20, 0 }
 0x24f   :  { %831 = shalt.err (%p1175_p3)  }
 0x250   :  { %833 = vsyncmov [#allocation3 + $0x19] }
 0x253   :  { %s834_s17 = vpop.sfrf %833 }
 0x254   :  { %p1176_p4 = scmp.ne.s32.totalorder %s834_s17, 0 }
 0x256   :  { %838 = shalt.err (%p1176_p4)  }
 0x257   :  { %840 = vsyncmov [#allocation3 + $0x1a] }
 0x25a   :  { %s841_s18 = vpop.sfrf %840 }
 0x25b   :  { %p1177_p5 = scmp.ne.s32.totalorder %s841_s18, 0 }
 0x25d   :  { %845 = shalt.err (%p1177_p5)  }
 0x25e   :  { %847 = vsyncmov [#allocation3 + $0x1b] }
 0x261   :  { %s848_s19 = vpop.sfrf %847 }
 0x262   :  { %p1178_p6 = scmp.ne.s32.totalorder %s848_s19, 0 }
 0x264   :  { %852 = shalt.err (%p1178_p6)  }
 0x265   :  { %854 = vsyncmov [#allocation3 + $0x1c] }
 0x268   :  { %s855_s22 = vpop.sfrf %854 }
 0x269   :  { %p1179_p7 = scmp.ne.s32.totalorder %s855_s22, 0 }
 0x26b   :  { %859 = shalt.err (%p1179_p7)  }
 0x26c   :  { %861 = vsyncmov [#allocation3 + $0x1d] }
 0x26f   :  { %s862_s23 = vpop.sfrf %861 }
 0x270   :  { %p1180_p8 = scmp.ne.s32.totalorder %s862_s23, 0 }
 0x272   :  { %866 = shalt.err (%p1180_p8)  }
 0x273   :  { %868 = vsyncmov [#allocation3 + $0x1e] }
 0x276   :  { %s869_s25 = vpop.sfrf %868 }
 0x277   :  { %p1181_p9 = scmp.ne.s32.totalorder %s869_s25, 0 }
 0x279   :  { %873 = shalt.err (%p1181_p9)  }
 0x27a   :  { %875 = vsyncmov [#allocation3 + $0x1f] }
 0x27d   :  { %s876_s29 = vpop.sfrf %875 }
 0x27e   :  { %p1182_p10 = scmp.ne.s32.totalorder %s876_s29, 0 }
 0x280   :  { %880 = shalt.err (%p1182_p10)  }

</bundles_post_ra>
